<compile_context>
chip_gen: v6e
topology: v6e:2x2x1
jax: 0.10.0
libtpu: 0.0.40
codegen_flags: <defaults>
</compile_context>

<pallas_src>
import jax
import jax.numpy as jnp
from jax.experimental import pallas as pl
from jax.experimental.pallas import tpu as pltpu

IN_DIM = 1056
HIDDEN_DIM = 512
OUT_DIM = 230


def cls_sp_kernel(x_ref, w1_ref, b1_ref, w2_ref, b2_ref, o_ref):
    # Layer 1: (tb, 1056) bf16 @ (1056, 512) bf16 -> f32 accumulation, f32 bias add.
    h = jnp.dot(x_ref[...], w1_ref[...], preferred_element_type=jnp.float32)
    h = h + b1_ref[...]
    # Layer 2: (tb, 512) bf16 @ (512, 256-pad) bf16 -> f32, f32 (padded) bias add.
    y = jnp.dot(h.astype(jnp.bfloat16), w2_ref[...],
                preferred_element_type=jnp.float32)
    y = y + b2_ref[...]
    o_ref[...] = y.astype(o_ref.dtype)


def cls_sp_forward(x, w1, b1, w2, b2, *, block_b=512, out_dtype=None):
    """x: (B, 1056) bf16 (f32 accepted, cast once); w1: (1056, 512) bf16;
    b1: (1, 512) f32; w2: (512, 230) bf16; b2: (1, 230) f32.
    Returns (B, 230) in `out_dtype` (defaults to x.dtype)."""
    B, in_dim = x.shape
    hidden = w1.shape[1]
    out_dim = w2.shape[1]
    out_dtype = x.dtype if out_dtype is None else out_dtype

    if x.dtype != jnp.bfloat16:
        # TODO(synk): push this cast upstream so the producer emits bf16 activations.
        x = x.astype(jnp.bfloat16)

    # Pad the output lane dim up to a multiple of 128 (lane-dense, unmasked stores).
    out_pad = pl.cdiv(out_dim, 128) * 128
    if out_pad != out_dim:
        w2p = jnp.pad(w2, ((0, 0), (0, out_pad - out_dim)))
        b2p = jnp.pad(b2, ((0, 0), (0, out_pad - out_dim)))
    else:
        w2p, b2p = w2, b2

    # Batch tile: big enough to amortize ~0.35 us/grid-step, tiny vs. VMEM
    # (bf16 x tile + resident weights + bf16 out tile, double-buffered, << 16 MiB).
    tb = min(block_b, max(8, ((B + 7) // 8) * 8))
    # v7x megacore: a single tile leaves one TensorCore idle.  For large B make sure
    # there are at least two "parallel" tiles (one extra step is noise on v5e/v6e).
    if B >= 256 and pl.cdiv(B, tb) < 2:
        tb = max(8, ((pl.cdiv(B, 2) + 7) // 8) * 8)
    grid_b = pl.cdiv(B, tb)  # ragged tail handled by Pallas OOB masking, no jnp.pad(x)

    flops = 2 * B * in_dim * hidden + 2 * B * hidden * out_pad
    bytes_accessed = (
        x.size * x.dtype.itemsize
        + w1.size * w1.dtype.itemsize
        + b1.size * b1.dtype.itemsize
        + w2p.size * w2p.dtype.itemsize
        + b2p.size * b2p.dtype.itemsize
        + B * out_pad * jnp.dtype(out_dtype).itemsize
    )

    out = pl.pallas_call(
        cls_sp_kernel,
        out_shape=jax.ShapeDtypeStruct((B, out_pad), out_dtype),
        grid=(grid_b,),
        in_specs=[
            pl.BlockSpec((tb, in_dim), lambda i: (i, 0)),        # x: tiled over batch
            pl.BlockSpec((in_dim, hidden), lambda i: (0, 0)),    # w1: VMEM-resident
            pl.BlockSpec((1, hidden), lambda i: (0, 0)),         # b1: resident
            pl.BlockSpec((hidden, out_pad), lambda i: (0, 0)),   # w2 (padded): resident
            pl.BlockSpec((1, out_pad), lambda i: (0, 0)),        # b2 (padded): resident
        ],
        out_specs=pl.BlockSpec((tb, out_pad), lambda i: (i, 0)),
        compiler_params=pltpu.CompilerParams(
            dimension_semantics=("parallel",) if grid_b > 1 else ("arbitrary",),
        ),
        cost_estimate=pl.CostEstimate(
            flops=flops, transcendentals=0, bytes_accessed=bytes_accessed),
    )(x, w1, b1, w2p, b2p)

    # Keep the 256-wide padded output for the consumer if it tolerates it; here we
    # honor the module contract and return exactly 230 logits.
    return out[:, :out_dim] if out_pad != out_dim else out


def init_params(key, in_dim=IN_DIM, hidden_dim=HIDDEN_DIM, out_dim=OUT_DIM):
    """Deterministic init mimicking torch.nn.Linear default (uniform +-1/sqrt(fan_in)).

    Weights are returned already transposed to (in, out) layout and stored in bf16
    (streamed to the MXU as-is); biases stay f32."""
    k1, k2, k3, k4 = jax.random.split(key, 4)
    bound1 = 1.0 / (in_dim ** 0.5)
    bound2 = 1.0 / (hidden_dim ** 0.5)
    w1 = jax.random.uniform(k1, (in_dim, hidden_dim), jnp.float32, -bound1, bound1)
    b1 = jax.random.uniform(k2, (1, hidden_dim), jnp.float32, -bound1, bound1)
    w2 = jax.random.uniform(k3, (hidden_dim, out_dim), jnp.float32, -bound2, bound2)
    b2 = jax.random.uniform(k4, (1, out_dim), jnp.float32, -bound2, bound2)
    return w1.astype(jnp.bfloat16), b1, w2.astype(jnp.bfloat16), b2


if __name__ == "__main__":
    key = jax.random.PRNGKey(0)
    k_x, k_p = jax.random.split(key)

    batch = 8
    # Producer emits bf16 activations (see perf notes above).
    x = jax.random.normal(k_x, (batch, IN_DIM), dtype=jnp.float32).astype(jnp.bfloat16)
    w1, b1, w2, b2 = init_params(k_p)

    out = cls_sp_forward(x, w1, b1, w2, b2)
    out = jax.block_until_ready(out)

    # Reference in plain JAX, mirroring the kernel's numerics:
    # bf16 operands into each matmul, f32 accumulation, f32 bias add, bf16 output.
    xf = x.astype(jnp.float32)
    w1f = w1.astype(jnp.float32)
    w2f = w2.astype(jnp.float32)
    h_ref = xf @ w1f + b1
    ref = h_ref.astype(jnp.bfloat16).astype(jnp.float32) @ w2f + b2

    assert out.shape == (batch, OUT_DIM), out.shape
    assert jnp.allclose(out.astype(jnp.float32), ref, atol=2e-2, rtol=2e-2), \
        "mismatch vs reference"

    print("KERNEL_OK")
</pallas_src>

<mosaic_0001>
module attributes {stable_mosaic.version = 11 : i64} {
  func.func @cls_sp_kernel(%arg0: i32, %arg1: memref<8x1056xbf16, #tpu.memory_space<vmem>>, %arg2: memref<1056x512xbf16, #tpu.memory_space<vmem>>, %arg3: memref<1x512xf32, #tpu.memory_space<vmem>>, %arg4: memref<512x256xbf16, #tpu.memory_space<vmem>>, %arg5: memref<1x256xf32, #tpu.memory_space<vmem>>, %arg6: memref<8x256xbf16, #tpu.memory_space<vmem>>) attributes {dimension_semantics = [#tpu.dimension_semantics<arbitrary>], iteration_bounds = array<i64: 1>, scalar_prefetch = 0 : i64, scratch_operands = 0 : i64, tpu.core_type = #tpu.core_type<tc>, window_params = [{transform_indices = @transform_0, window_bounds = array<i64: 8, 1056>}, {pipeline_mode = #tpu.pipeline_mode<synchronous>, transform_indices = @transform_1, window_bounds = array<i64: 1056, 512>}, {pipeline_mode = #tpu.pipeline_mode<synchronous>, transform_indices = @transform_2, window_bounds = array<i64: 1, 512>}, {pipeline_mode = #tpu.pipeline_mode<synchronous>, transform_indices = @transform_3, window_bounds = array<i64: 512, 256>}, {pipeline_mode = #tpu.pipeline_mode<synchronous>, transform_indices = @transform_4, window_bounds = array<i64: 1, 256>}, {transform_indices = @transform_5, window_bounds = array<i64: 8, 256>}]} {
    %c0 = arith.constant 0 : index
    %c0_0 = arith.constant 0 : index
    %0 = vector.load %arg1[%c0, %c0_0] : memref<8x1056xbf16, #tpu.memory_space<vmem>>, vector<8x1056xbf16>
    %c0_1 = arith.constant 0 : index
    %c0_2 = arith.constant 0 : index
    %1 = vector.load %arg2[%c0_1, %c0_2] : memref<1056x512xbf16, #tpu.memory_space<vmem>>, vector<1056x512xbf16>
    %cst = arith.constant dense<0.000000e+00> : vector<8x512xf32>
    %2 = tpu.matmul %0, %1, %cst {dimension_numbers = #tpu.dot_dimension_numbers<[1], [0], [0], [1], [0, 0, 1, 1], [], []>} : vector<8x1056xbf16>, vector<1056x512xbf16>, vector<8x512xf32> -> vector<8x512xf32>
    %c0_3 = arith.constant 0 : index
    %c0_4 = arith.constant 0 : index
    %3 = vector.load %arg3[%c0_3, %c0_4] : memref<1x512xf32, #tpu.memory_space<vmem>>, vector<1x512xf32>
    %4 = vector.broadcast %3 : vector<1x512xf32> to vector<8x512xf32>
    %5 = arith.addf %2, %4 : vector<8x512xf32>
    %6 = arith.truncf %5 : vector<8x512xf32> to vector<8x512xbf16>
    %c0_5 = arith.constant 0 : index
    %c0_6 = arith.constant 0 : index
    %7 = vector.load %arg4[%c0_5, %c0_6] : memref<512x256xbf16, #tpu.memory_space<vmem>>, vector<512x256xbf16>
    %cst_7 = arith.constant dense<0.000000e+00> : vector<8x256xf32>
    %8 = tpu.matmul %6, %7, %cst_7 {dimension_numbers = #tpu.dot_dimension_numbers<[1], [0], [0], [1], [0, 0, 1, 1], [], []>} : vector<8x512xbf16>, vector<512x256xbf16>, vector<8x256xf32> -> vector<8x256xf32>
    %c0_8 = arith.constant 0 : index
    %c0_9 = arith.constant 0 : index
    %9 = vector.load %arg5[%c0_8, %c0_9] : memref<1x256xf32, #tpu.memory_space<vmem>>, vector<1x256xf32>
    %10 = vector.broadcast %9 : vector<1x256xf32> to vector<8x256xf32>
    %11 = arith.addf %8, %10 : vector<8x256xf32>
    %12 = arith.truncf %11 : vector<8x256xf32> to vector<8x256xbf16>
    %c0_10 = arith.constant 0 : index
    %c0_11 = arith.constant 0 : index
    %13 = vector.load %arg6[%c0_10, %c0_11] : memref<8x256xbf16, #tpu.memory_space<vmem>>, vector<8x256xbf16>
    tpu.vector_store %arg6[%c0_10, %c0_11], %12 {strides = array<i32>} : memref<8x256xbf16, #tpu.memory_space<vmem>>, vector<8x256xbf16>,
    return
  }
  func.func @transform_0(%arg0: i32) -> (i32, i32) {
    %c0_i32 = arith.constant 0 : i32
    %c0_i32_0 = arith.constant 0 : i32
    return %arg0, %c0_i32 : i32, i32
  }
  func.func @transform_1(%arg0: i32) -> (i32, i32) {
    %c0_i32 = arith.constant 0 : i32
    %c0_i32_0 = arith.constant 0 : i32
    %c0_i32_1 = arith.constant 0 : i32
    return %c0_i32, %c0_i32_0 : i32, i32
  }
  func.func @transform_2(%arg0: i32) -> (i32, i32) {
    %c0_i32 = arith.constant 0 : i32
    %c0_i32_0 = arith.constant 0 : i32
    %c0_i32_1 = arith.constant 0 : i32
    return %c0_i32, %c0_i32_0 : i32, i32
  }
  func.func @transform_3(%arg0: i32) -> (i32, i32) {
    %c0_i32 = arith.constant 0 : i32
    %c0_i32_0 = arith.constant 0 : i32
    %c0_i32_1 = arith.constant 0 : i32
    return %c0_i32, %c0_i32_0 : i32, i32
  }
  func.func @transform_4(%arg0: i32) -> (i32, i32) {
    %c0_i32 = arith.constant 0 : i32
    %c0_i32_0 = arith.constant 0 : i32
    %c0_i32_1 = arith.constant 0 : i32
    return %c0_i32, %c0_i32_0 : i32, i32
  }
  func.func @transform_5(%arg0: i32) -> (i32, i32) {
    %c0_i32 = arith.constant 0 : i32
    %c0_i32_0 = arith.constant 0 : i32
    return %arg0, %c0_i32 : i32, i32
  }
}

</mosaic_0001>

<bundles_post_ra>
// kernel: tpu_custom_call.1
= control target key start
LH: loop header
LB: loop body
LE: loop exit
PB: predicated region body
PF: predicated region fallthrough
CT: control target
= control target key end

     0   :  { %10 = vsyncpa [#allocation3], 0  ;;  %s3766_s0 = inlined_call_operand.hbm [shape: bf16[8,1056], index: 0, kind: input, shape index: {}]   ;;  %s3767_s1 = inlined_call_operand.hbm [shape: bf16[1056,512], index: 1, kind: input, shape index: {}]   ;;  %s3768_s2 = inlined_call_operand.hbm [shape: f32[1,512], index: 2, kind: input, shape index: {}]   ;;  %s3769_s3 = inlined_call_operand.hbm [shape: bf16[512,256], index: 3, kind: input, shape index: {}]   ;;  %s3770_s4 = inlined_call_operand.hbm [shape: f32[1,256], index: 4, kind: input, shape index: {}]   ;;  %s3771_s5 = inlined_call_operand.hbm [shape: bf16[8,256], index: 5, kind: output, shape index: {}]  }
   0x1   :  { %11 = vsyncpa [#allocation6], 0 }
   0x2   :  { %12 = vsyncpa [#allocation9], 0 }
   0x3   :  { %13 = vsyncpa [#allocation4], 0  ;;  %s3629_s18 = smov [#allocation5]  }
   0x4   :  { %s29_s19 = sshll.u32 %s3629_s18, 4  ;;  %s30_s19 = int_to_ptr.vmem [resolvable:$true] %s29_s19 }
   0x5   :  { %s3509_s20 = scalar_lea.vmem %s30_s19, 33792  ;;  %p3514_p1 = scmp.lt.s32.totalorder %s30_s19, %s30_s19 }
   0x6   :  { %p3510_p0 = scmp.ne.s32.totalorder %s30_s19, %s3509_s20  ;;  %p3515_p2 = scmp.lt.s32.totalorder %s3509_s20, %s3509_s20 }
   0x8   :  { %p3516_p3 = por %p3515_p2, %p3514_p1 }
   0xa   :  { %p3517_p4 = pnand %p3516_p3, %p3510_p0 }
   0xc   :  { %3520 = shalt.err (!%p3517_p4)
}
   0xd   :  { %s3630_s21 = smov 256   ;;  %s3631_s22 = smov 16  }
   0xe   :  { %35 = dma.hbm_to_vmem [thread:$0]  %s3767_s1, 33792, %s30_s19, [#allocation6], %s3630_s21, %s3630_s21, %s3631_s22  }
   0xf   :  { %s3632_s25 = smov [#allocation8]  }
  0x10   :  { %s51_s26 = sshll.u32 %s3632_s25, 4  ;;  %s52_s26 = int_to_ptr.vmem [resolvable:$true] %s51_s26 }
  0x11   :  { %s3529_s27 = scalar_lea.vmem %s52_s26, 8192  ;;  %p3534_p6 = scmp.lt.s32.totalorder %s52_s26, %s52_s26 }
  0x12   :  { %p3530_p5 = scmp.ne.s32.totalorder %s52_s26, %s3529_s27  ;;  %p3535_p7 = scmp.lt.s32.totalorder %s3529_s27, %s3529_s27 }
  0x14   :  { %p3536_p8 = por %p3535_p7, %p3534_p6 }
  0x16   :  { %p3537_p9 = pnand %p3536_p8, %p3530_p5 }
  0x18   :  { %3540 = shalt.err (!%p3537_p9)
}
  0x19   :  { %s3633_s28 = smov 128   ;;  %s3634_s29 = smov 8  }
  0x1a   :  { %57 = dma.hbm_to_vmem [thread:$0]  %s3769_s3, 8192, %s52_s26, [#allocation9], %s3633_s28, %s3633_s28, %s3634_s29  }
  0x1b   :  { %s3635_s7 = smov [#allocation2]   ;;  %s3636_s9 = smov [#allocation7]  }
  0x1c   :  { %s20_s8 = sshll.u32 %s3635_s7, 4  ;;  %s42_s1 = sshll.u32 %s3636_s9, 4  ;;  %s21_s8 = int_to_ptr.vmem [resolvable:$true] %s20_s8  ;;  %s43_s1 = int_to_ptr.vmem [resolvable:$true] %s42_s1 }
  0x1d   :  { %s3549_s10 = scalar_lea.vmem %s21_s8, 576  ;;  %p3554_p11 = scmp.lt.s32.totalorder %s21_s8, %s21_s8 }
  0x1e   :  { %p3550_p10 = scmp.ne.s32.totalorder %s21_s8, %s3549_s10  ;;  %p3555_p12 = scmp.lt.s32.totalorder %s3549_s10, %s3549_s10 }
  0x20   :  { %p3556_p13 = por %p3555_p12, %p3554_p11 }
  0x22   :  { %p3557_p0 = pnand %p3556_p13, %p3550_p10 }
  0x24   :  { %3560 = shalt.err (!%p3557_p0)
}
  0x25   :  { %23 = dma.hbm_to_vmem [thread:$0]  %s3766_s0, 576, %s21_s8, [#allocation3]  }
  0x26   :  { %s3569_s13 = scalar_lea.vmem %s43_s1, 64  ;;  %p3574_p2 = scmp.lt.s32.totalorder %s43_s1, %s43_s1 }
  0x27   :  { %p3570_p1 = scmp.ne.s32.totalorder %s43_s1, %s3569_s13  ;;  %p3575_p3 = scmp.lt.s32.totalorder %s3569_s13, %s3569_s13 }
  0x29   :  { %p3576_p4 = por %p3575_p3, %p3574_p2 }
  0x2b   :  { %p3577_p5 = pnand %p3576_p4, %p3570_p1 }
  0x2d   :  { %3580 = shalt.err (!%p3577_p5)
}
  0x2e   :  { %45 = dma.hbm_to_vmem [thread:$0]  %s3768_s2, 64, %s43_s1, [#allocation6]  }
  0x2f   :  { %s3637_s15 = smov [#allocation10]  }
  0x30   :  { %s64_s16 = sshll.u32 %s3637_s15, 4  ;;  %s65_s16 = int_to_ptr.vmem [resolvable:$true] %s64_s16 }
  0x31   :  { %s3589_s17 = scalar_lea.vmem %s65_s16, 32  ;;  %p3594_p7 = scmp.lt.s32.totalorder %s65_s16, %s65_s16 }
  0x32   :  { %p3590_p6 = scmp.ne.s32.totalorder %s65_s16, %s3589_s17  ;;  %p3595_p8 = scmp.lt.s32.totalorder %s3589_s17, %s3589_s17 }
  0x34   :  { %p3596_p9 = por %p3595_p8, %p3594_p7 }
  0x36   :  { %p3597_p10 = pnand %p3596_p9, %p3590_p6 }
  0x38   :  { %3600 = shalt.err (!%p3597_p10)
}
  0x39   :  { %67 = dma.hbm_to_vmem [thread:$0]  %s3770_s4, 32, %s65_s16, [#allocation9]  }
  0x3a   :  { %3621 = dma.done.wait [#allocation3], 576  }
  0x3b   :  { %3622 = vsyncadd [#allocation3], 4294966720 }
  0x3c   :  { %3623 = dma.done.wait [#allocation6], 33856  }
  0x3d   :  { %3624 = vsyncadd [#allocation6], 4294933440 }
  0x3e   :  { %3625 = dma.done.wait [#allocation9], 8224  }
  0x3f   :  { %3626 = vsyncadd [#allocation9], 4294959072  ;;  %v3000_v0 = vld [vmem:[#allocation5 + $0xe4] ss:$16 sps:$4 sm:$0xff]   ;;  %v3004_v2 = vld [vmem:[#allocation5 + $0xe0] ss:$16 sps:$4 sm:$0xff]  }
  0x40   :  { %v3002_v1 = vld [vmem:[#allocation5 + $0x2e4] ss:$16 sps:$4 sm:$0xff]   ;;  %1730 = vmatprep.subr.bf16.mxu0 %v3000_v0  ;;  %v3005_v3 = vld [vmem:[#allocation5 + $0x2e0] ss:$16 sps:$4 sm:$0xff]   ;;  %vm1726_vm0 = vcmask 261120   ;;  %s3639_s2 = smov [#allocation11]  }
  0x41   :  { %1771 = vmatprep.subr.bf16.mxu1 %v3002_v1  ;;  %v3006_v4 = vld [vmem:[#allocation5 + $0xc4] ss:$16 sps:$4 sm:$0xff]   ;;  %1731 = vmatpush1.bf16.msra.mxu0 %v3004_v2  ;;  %v3010_v6 = vld [vmem:[#allocation5 + $0xc0] ss:$16 sps:$4 sm:$0xff]   ;;  %s2637_s4 = sshll.u32 %s3639_s2, 4  ;;  %s2638_s4 = int_to_ptr.vmem [resolvable:$true] %s2637_s4 }
  0x42   :  { %1772 = vmatpush1.bf16.msra.mxu1 %v3005_v3  ;;  %v3008_v5 = vld [vmem:[#allocation5 + $0x2c4] ss:$16 sps:$4 sm:$0xff]   ;;  %1732 = vmatprep.subr.bf16.mxu0 %v3006_v4  ;;  %v3011_v7 = vld [vmem:[#allocation5 + $0x2c0] ss:$16 sps:$4 sm:$0xff]   ;;  %s3601_s19 = scalar_lea.vmem %s2638_s4, 128  ;;  %p3606_p12 = scmp.lt.s32.totalorder %s2638_s4, %s2638_s4 }
  0x43   :  { %1773 = vmatprep.subr.bf16.mxu1 %v3008_v5  ;;  %v3012_v8 = vld [vmem:[#allocation5 + $0xa4] ss:$16 sps:$4 sm:$0xff]   ;;  %v3016_v10 = vld [vmem:[#allocation5 + $0xa0] ss:$16 sps:$4 sm:$0xff]   ;;  %p3602_p11 = scmp.ne.s32.totalorder %s2638_s4, %s3601_s19  ;;  %p3607_p13 = scmp.lt.s32.totalorder %s3601_s19, %s3601_s19 }
  0x44   :  { %v3014_v9 = vld [vmem:[#allocation5 + $0x2a4] ss:$16 sps:$4 sm:$0xff]   ;;  %v3017_v11 = vld [vmem:[#allocation5 + $0x2a0] ss:$16 sps:$4 sm:$0xff]  }
  0x45   :  { %1733 = vmatpush1.bf16.msra.mxu0 %v3010_v6  ;;  %v3018_v12 = vld [vmem:[#allocation5 + $0x84] ss:$16 sps:$4 sm:$0xff]   ;;  %v3022_v14 = vld [vmem:[#allocation5 + $0x80] ss:$16 sps:$4 sm:$0xff]   ;;  %p3608_p0 = por %p3607_p13, %p3606_p12 }
  0x46   :  { %1774 = vmatpush1.bf16.msra.mxu1 %v3011_v7  ;;  %1734 = vmatprep.subr.bf16.mxu0 %v3012_v8  ;;  %v3020_v13 = vld [vmem:[#allocation5 + $0x284] ss:$16 sps:$4 sm:$0xff]   ;;  %v3023_v15 = vld [vmem:[#allocation5 + $0x280] ss:$16 sps:$4 sm:$0xff]  }
  0x47   :  { %1775 = vmatprep.subr.bf16.mxu1 %v3014_v9  ;;  %v3024_v16 = vld [vmem:[#allocation5 + $0x64] ss:$16 sps:$4 sm:$0xff]   ;;  %v3028_v18 = vld [vmem:[#allocation5 + $0x60] ss:$16 sps:$4 sm:$0xff]   ;;  %p3609_p1 = pnand %p3608_p0, %p3602_p11 }
  0x48   :  { %v3026_v17 = vld [vmem:[#allocation5 + $0x264] ss:$16 sps:$4 sm:$0xff]   ;;  %v3029_v19 = vld [vmem:[#allocation5 + $0x260] ss:$16 sps:$4 sm:$0xff]  }
  0x49   :  { %1735 = vmatpush1.bf16.msra.mxu0 %v3016_v10  ;;  %v3030_v20 = vld [vmem:[#allocation5 + $0x44] ss:$16 sps:$4 sm:$0xff]   ;;  %v3034_v22 = vld [vmem:[#allocation5 + $0x40] ss:$16 sps:$4 sm:$0xff]  }
  0x4a   :  { %1776 = vmatpush1.bf16.msra.mxu1 %v3017_v11  ;;  %1736 = vmatprep.subr.bf16.mxu0 %v3018_v12  ;;  %v3032_v21 = vld [vmem:[#allocation5 + $0x244] ss:$16 sps:$4 sm:$0xff]   ;;  %v3035_v23 = vld [vmem:[#allocation5 + $0x240] ss:$16 sps:$4 sm:$0xff]  }
  0x4b   :  { %1777 = vmatprep.subr.bf16.mxu1 %v3020_v13  ;;  %v3036_v24 = vld [vmem:[#allocation5 + $0x24] ss:$16 sps:$4 sm:$0xff]   ;;  %v3040_v26 = vld [vmem:[#allocation5 + $0x20] ss:$16 sps:$4 sm:$0xff]  }
  0x4c   :  { %v3038_v25 = vld [vmem:[#allocation5 + $0x224] ss:$16 sps:$4 sm:$0xff]   ;;  %v3041_v27 = vld [vmem:[#allocation5 + $0x220] ss:$16 sps:$4 sm:$0xff]  }
  0x4d   :  { %1737 = vmatpush1.bf16.msra.mxu0 %v3022_v14  ;;  %v3042_v28 = vld [vmem:[#allocation5 + $0x4] ss:$16 sps:$4 sm:$0xff]   ;;  %v3046_v30 = vld [vmem:[#allocation5] ss:$16 sps:$4 sm:$0xff]  }
  0x4e   :  { %1778 = vmatpush1.bf16.msra.mxu1 %v3023_v15  ;;  %1738 = vmatprep.subr.bf16.mxu0 %v3024_v16  ;;  %v3044_v29 = vld [vmem:[#allocation5 + $0x204] ss:$16 sps:$4 sm:$0xff]   ;;  %v3047_v31 = vld [vmem:[#allocation5 + $0x200] ss:$16 sps:$4 sm:$0xff]  }
  0x4f   :  { %1779 = vmatprep.subr.bf16.mxu1 %v3026_v17  ;;  %v3048_v32 = vld [vmem:[#allocation5 + $0x1e4] ss:$16 sps:$4 sm:$0xff]   ;;  %v3052_v34 = vld [vmem:[#allocation5 + $0x1e0] ss:$16 sps:$4 sm:$0xff]  }
  0x50   :  { %v3050_v33 = vld [vmem:[#allocation5 + $0x3e4] ss:$16 sps:$4 sm:$0xff]   ;;  %v3053_v35 = vld [vmem:[#allocation5 + $0x3e0] ss:$16 sps:$4 sm:$0xff]  }
  0x51   :  { %1739 = vmatpush1.bf16.msra.mxu0 %v3028_v18  ;;  %v3054_v36 = vld [vmem:[#allocation5 + $0x1c4] ss:$16 sps:$4 sm:$0xff]   ;;  %v3058_v38 = vld [vmem:[#allocation5 + $0x1c0] ss:$16 sps:$4 sm:$0xff]  }
  0x52   :  { %1780 = vmatpush1.bf16.msra.mxu1 %v3029_v19  ;;  %1740 = vmatprep.subr.bf16.mxu0 %v3030_v20  ;;  %v3056_v37 = vld [vmem:[#allocation5 + $0x3c4] ss:$16 sps:$4 sm:$0xff]   ;;  %v3059_v39 = vld [vmem:[#allocation5 + $0x3c0] ss:$16 sps:$4 sm:$0xff]  }
  0x53   :  { %1781 = vmatprep.subr.bf16.mxu1 %v3032_v21  ;;  %v3060_v40 = vld [vmem:[#allocation5 + $0x1a4] ss:$16 sps:$4 sm:$0xff]   ;;  %v3064_v42 = vld [vmem:[#allocation5 + $0x1a0] ss:$16 sps:$4 sm:$0xff]  }
  0x54   :  { %v3062_v41 = vld [vmem:[#allocation5 + $0x3a4] ss:$16 sps:$4 sm:$0xff]   ;;  %v3065_v43 = vld [vmem:[#allocation5 + $0x3a0] ss:$16 sps:$4 sm:$0xff]  }
  0x55   :  { %1741 = vmatpush1.bf16.msra.mxu0 %v3034_v22  ;;  %v3066_v44 = vld [vmem:[#allocation5 + $0x184] ss:$16 sps:$4 sm:$0xff]   ;;  %v84_v46 = vld [vmem:[#allocation2] sm:$0xff] }
  0x56   :  { %1782 = vmatpush1.bf16.msra.mxu1 %v3035_v23  ;;  %1742 = vmatprep.subr.bf16.mxu0 %v3036_v24  ;;  %v3068_v45 = vld [vmem:[#allocation5 + $0x384] ss:$16 sps:$4 sm:$0xff]   ;;  %v3685_v47 = vcombine.high %v84_v46, %v84_v46  ;;  %v3070_v49 = vld [vmem:[#allocation5 + $0x180] ss:$16 sps:$4 sm:$0xff]   ;;  %v3691_v6 = vcombine.low %v84_v46, %v84_v46 }
  0x57   :  { %1783 = vmatprep.subr.bf16.mxu1 %v3038_v25  ;;  %v85_v48 = vld [vmem:[#allocation2 + $0x8] sm:$0xff]  ;;  %v3071_v50 = vld [vmem:[#allocation5 + $0x380] ss:$16 sps:$4 sm:$0xff]  }
  0x58   :  { %v3687_v51 = vcombine.high %v85_v48, %v85_v48  ;;  %v3072_v52 = vld [vmem:[#allocation5 + $0x164] ss:$16 sps:$4 sm:$0xff]   ;;  %1762 = vmatprep.mubr.bf16.mxu0 %v3685_v47  ;;  %v3076_v54 = vld [vmem:[#allocation5 + $0x160] ss:$16 sps:$4 sm:$0xff]   ;;  %v3693_v7 = vcombine.low %v85_v48, %v85_v48 }
  0x59   :  { %1743 = vmatpush1.bf16.msra.mxu0 %v3040_v26  ;;  %v3074_v53 = vld [vmem:[#allocation5 + $0x364] ss:$16 sps:$4 sm:$0xff]   ;;  %v3077_v55 = vld [vmem:[#allocation5 + $0x360] ss:$16 sps:$4 sm:$0xff]  }
  0x5a   :  { %1784 = vmatpush1.bf16.msra.mxu1 %v3041_v27  ;;  %1744 = vmatprep.subr.bf16.mxu0 %v3042_v28  ;;  %v3078_v56 = vld [vmem:[#allocation5 + $0x144] ss:$16 sps:$4 sm:$0xff]   ;;  %v3082_v58 = vld [vmem:[#allocation5 + $0x140] ss:$16 sps:$4 sm:$0xff]  }
  0x5b   :  { %1785 = vmatprep.subr.bf16.mxu1 %v3044_v29  ;;  %1803 = vmatprep.mubr.bf16.mxu1 %v3687_v51  ;;  %v3080_v57 = vld [vmem:[#allocation5 + $0x344] ss:$16 sps:$4 sm:$0xff]   ;;  %v3083_v59 = vld [vmem:[#allocation5 + $0x340] ss:$16 sps:$4 sm:$0xff]  }
  0x5c   :  { %v3084_v60 = vld [vmem:[#allocation5 + $0x124] ss:$16 sps:$4 sm:$0xff]   ;;  %v3088_v62 = vld [vmem:[#allocation5 + $0x120] ss:$16 sps:$4 sm:$0xff]  }
  0x5d   :  { %1745 = vmatpush1.bf16.msra.mxu0 %v3046_v30  ;;  %v3086_v61 = vld [vmem:[#allocation5 + $0x324] ss:$16 sps:$4 sm:$0xff]   ;;  %v3089_v63 = vld [vmem:[#allocation5 + $0x320] ss:$16 sps:$4 sm:$0xff]  }
  0x5e   :  { %1786 = vmatpush1.bf16.msra.mxu1 %v3047_v31  ;;  %1746 = vmatprep.subr.bf16.mxu0 %v3048_v32  ;;  %v3090_v0 = vld [vmem:[#allocation5 + $0x104] ss:$16 sps:$4 sm:$0xff]   ;;  %v3094_v2 = vld [vmem:[#allocation5 + $0x100] ss:$16 sps:$4 sm:$0xff]  }
  0x5f   :  { %1787 = vmatprep.subr.bf16.mxu1 %v3050_v33  ;;  %v3092_v1 = vld [vmem:[#allocation5 + $0x304] ss:$16 sps:$4 sm:$0xff]   ;;  %v3095_v3 = vld [vmem:[#allocation5 + $0x300] ss:$16 sps:$4 sm:$0xff]  }
  0x60   :  { %v3102_v4 = vld [vmem:[#allocation5 + $0x4e4] ss:$16 sps:$4 sm:$0xff]   ;;  %v3100_v8 = vld [vmem:[#allocation5 + $0x4e0] ss:$16 sps:$4 sm:$0xff]  }
  0x61   :  { %1747 = vmatpush2.bf16.msra.mxu0 %v3052_v34  ;;  %v3105_v5 = vld [vmem:[#allocation5 + $0x6e4] ss:$16 sps:$4 sm:$0xff]   ;;  %v3103_v9 = vld [vmem:[#allocation5 + $0x6e0] ss:$16 sps:$4 sm:$0xff]  }
  0x62   :  { %1788 = vmatpush2.bf16.msra.mxu1 %v3053_v35  ;;  %1748 = vmatprep.subr.bf16.mxu0 %v3054_v36  ;;  %v3108_v10 = vld [vmem:[#allocation5 + $0x4c4] ss:$16 sps:$4 sm:$0xff]   ;;  %v3106_v12 = vld [vmem:[#allocation5 + $0x4c0] ss:$16 sps:$4 sm:$0xff]  }
  0x63   :  { %1789 = vmatprep.subr.bf16.mxu1 %v3056_v37  ;;  %v3111_v11 = vld [vmem:[#allocation5 + $0x6c4] ss:$16 sps:$4 sm:$0xff]   ;;  %v3109_v13 = vld [vmem:[#allocation5 + $0x6c0] ss:$16 sps:$4 sm:$0xff]  }
  0x64   :  { %v3114_v14 = vld [vmem:[#allocation5 + $0x4a4] ss:$16 sps:$4 sm:$0xff]   ;;  %v3112_v16 = vld [vmem:[#allocation5 + $0x4a0] ss:$16 sps:$4 sm:$0xff]  }
  0x65   :  { %1749 = vmatpush2.bf16.msra.mxu0 %v3058_v38  ;;  %v3117_v15 = vld [vmem:[#allocation5 + $0x6a4] ss:$16 sps:$4 sm:$0xff]   ;;  %v3115_v17 = vld [vmem:[#allocation5 + $0x6a0] ss:$16 sps:$4 sm:$0xff]  }
  0x66   :  { %1790 = vmatpush2.bf16.msra.mxu1 %v3059_v39  ;;  %1750 = vmatprep.subr.bf16.mxu0 %v3060_v40  ;;  %v3120_v18 = vld [vmem:[#allocation5 + $0x484] ss:$16 sps:$4 sm:$0xff]   ;;  %v3118_v20 = vld [vmem:[#allocation5 + $0x480] ss:$16 sps:$4 sm:$0xff]  }
  0x67   :  { %1791 = vmatprep.subr.bf16.mxu1 %v3062_v41  ;;  %v3123_v19 = vld [vmem:[#allocation5 + $0x684] ss:$16 sps:$4 sm:$0xff]   ;;  %v3121_v21 = vld [vmem:[#allocation5 + $0x680] ss:$16 sps:$4 sm:$0xff]  }
  0x68   :  { %v3126_v22 = vld [vmem:[#allocation5 + $0x464] ss:$16 sps:$4 sm:$0xff]   ;;  %v3124_v24 = vld [vmem:[#allocation5 + $0x460] ss:$16 sps:$4 sm:$0xff]  }
  0x69   :  { %1751 = vmatpush2.bf16.msra.mxu0 %v3064_v42  ;;  %v3129_v23 = vld [vmem:[#allocation5 + $0x664] ss:$16 sps:$4 sm:$0xff]   ;;  %v3127_v25 = vld [vmem:[#allocation5 + $0x660] ss:$16 sps:$4 sm:$0xff]  }
  0x6a   :  { %1792 = vmatpush2.bf16.msra.mxu1 %v3065_v43  ;;  %1752 = vmatprep.subr.bf16.mxu0 %v3066_v44  ;;  %v3132_v26 = vld [vmem:[#allocation5 + $0x444] ss:$16 sps:$4 sm:$0xff]   ;;  %v3130_v28 = vld [vmem:[#allocation5 + $0x440] ss:$16 sps:$4 sm:$0xff]  }
  0x6b   :  { %1793 = vmatprep.subr.bf16.mxu1 %v3068_v45  ;;  %v3135_v27 = vld [vmem:[#allocation5 + $0x644] ss:$16 sps:$4 sm:$0xff]   ;;  %v3133_v29 = vld [vmem:[#allocation5 + $0x640] ss:$16 sps:$4 sm:$0xff]  }
  0x6c   :  { %v3138_v30 = vld [vmem:[#allocation5 + $0x424] ss:$16 sps:$4 sm:$0xff]   ;;  %v3697_v32 = vld [vmem:[#allocation2 + $0x10] sm:$0xff] }
  0x6d   :  { %1753 = vmatpush2.bf16.msra.mxu0 %v3070_v49  ;;  %v3141_v31 = vld [vmem:[#allocation5 + $0x624] ss:$16 sps:$4 sm:$0xff]   ;;  %v3136_v34 = vld [vmem:[#allocation5 + $0x420] ss:$16 sps:$4 sm:$0xff]   ;;  %v3703_v36 = vcombine.high %v3697_v32, %v3697_v32 }
  0x6e   :  { %1794 = vmatpush2.bf16.msra.mxu1 %v3071_v50  ;;  %1754 = vmatprep.subr.bf16.mxu0 %v3072_v52  ;;  %v3699_v33 = vld [vmem:[#allocation2 + $0x18] sm:$0xff]  ;;  %v3139_v35 = vld [vmem:[#allocation5 + $0x620] ss:$16 sps:$4 sm:$0xff]  }
  0x6f   :  { %1795 = vmatprep.subr.bf16.mxu1 %v3074_v53  ;;  %v3707_v37 = vcombine.high %v3699_v33, %v3699_v33  ;;  %v3144_v38 = vld [vmem:[#allocation5 + $0x404] ss:$16 sps:$4 sm:$0xff]   ;;  %v3142_v40 = vld [vmem:[#allocation5 + $0x400] ss:$16 sps:$4 sm:$0xff]  }
  0x70   :  { %v3147_v39 = vld [vmem:[#allocation5 + $0x604] ss:$16 sps:$4 sm:$0xff]   ;;  %v3145_v41 = vld [vmem:[#allocation5 + $0x600] ss:$16 sps:$4 sm:$0xff]  }
  0x71   :  { %1755 = vmatpush2.bf16.msra.mxu0 %v3076_v54  ;;  %v3150_v42 = vld [vmem:[#allocation5 + $0x5e4] ss:$16 sps:$4 sm:$0xff]   ;;  %v3148_v44 = vld [vmem:[#allocation5 + $0x5e0] ss:$16 sps:$4 sm:$0xff]  }
  0x72   :  { %1796 = vmatpush2.bf16.msra.mxu1 %v3077_v55  ;;  %1756 = vmatprep.subr.bf16.mxu0 %v3078_v56  ;;  %v3153_v43 = vld [vmem:[#allocation5 + $0x7e4] ss:$16 sps:$4 sm:$0xff]   ;;  %v3151_v45 = vld [vmem:[#allocation5 + $0x7e0] ss:$16 sps:$4 sm:$0xff]  }
  0x73   :  { %1797 = vmatprep.subr.bf16.mxu1 %v3080_v57  ;;  %v3156_v46 = vld [vmem:[#allocation5 + $0x5c4] ss:$16 sps:$4 sm:$0xff]   ;;  %v3154_v49 = vld [vmem:[#allocation5 + $0x5c0] ss:$16 sps:$4 sm:$0xff]  }
  0x74   :  { %v3159_v48 = vld [vmem:[#allocation5 + $0x7c4] ss:$16 sps:$4 sm:$0xff]   ;;  %v3157_v50 = vld [vmem:[#allocation5 + $0x7c0] ss:$16 sps:$4 sm:$0xff]  }
  0x75   :  { %1757 = vmatpush2.bf16.msra.mxu0 %v3082_v58  ;;  %v3162_v52 = vld [vmem:[#allocation5 + $0x5a4] ss:$16 sps:$4 sm:$0xff]   ;;  %v3160_v54 = vld [vmem:[#allocation5 + $0x5a0] ss:$16 sps:$4 sm:$0xff]  }
  0x76   :  { %1798 = vmatpush2.bf16.msra.mxu1 %v3083_v59  ;;  %1758 = vmatprep.subr.bf16.mxu0 %v3084_v60  ;;  %v3165_v53 = vld [vmem:[#allocation5 + $0x7a4] ss:$16 sps:$4 sm:$0xff]   ;;  %v3163_v55 = vld [vmem:[#allocation5 + $0x7a0] ss:$16 sps:$4 sm:$0xff]  }
  0x77   :  { %1799 = vmatprep.subr.bf16.mxu1 %v3086_v61  ;;  %v3168_v56 = vld [vmem:[#allocation5 + $0x584] ss:$16 sps:$4 sm:$0xff]   ;;  %v3166_v58 = vld [vmem:[#allocation5 + $0x580] ss:$16 sps:$4 sm:$0xff]  }
  0x78   :  { %v3171_v57 = vld [vmem:[#allocation5 + $0x784] ss:$16 sps:$4 sm:$0xff]   ;;  %v3169_v59 = vld [vmem:[#allocation5 + $0x780] ss:$16 sps:$4 sm:$0xff]  }
  0x79   :  { %1759 = vmatpush2.bf16.msra.mxu0 %v3088_v62  ;;  %v3174_v60 = vld [vmem:[#allocation5 + $0x564] ss:$16 sps:$4 sm:$0xff]   ;;  %v3172_v62 = vld [vmem:[#allocation5 + $0x560] ss:$16 sps:$4 sm:$0xff]  }
  0x7a   :  { %1800 = vmatpush2.bf16.msra.mxu1 %v3089_v63  ;;  %1760 = vmatprep.subr.bf16.mxu0 %v3090_v0  ;;  %v3177_v61 = vld [vmem:[#allocation5 + $0x764] ss:$16 sps:$4 sm:$0xff]   ;;  %v3175_v63 = vld [vmem:[#allocation5 + $0x760] ss:$16 sps:$4 sm:$0xff]  }
  0x7b   :  { %1801 = vmatprep.subr.bf16.mxu1 %v3092_v1  ;;  %v3180_v0 = vld [vmem:[#allocation5 + $0x544] ss:$16 sps:$4 sm:$0xff]  }
  0x7c   :  { %v3183_v1 = vld [vmem:[#allocation5 + $0x744] ss:$16 sps:$4 sm:$0xff]  }
  0x7d   :  { %1761 = vmatpush2.bf16.msra.mxu0 %v3094_v2  ;;  %v3178_v2 = vld [vmem:[#allocation5 + $0x540] ss:$16 sps:$4 sm:$0xff]  }
  0x7e   :  { %1802 = vmatpush2.bf16.msra.mxu1 %v3095_v3  ;;  %1812 = vmatprep.subr.bf16.mxu0 %v3102_v4  ;;  %v3181_v3 = vld [vmem:[#allocation5 + $0x740] ss:$16 sps:$4 sm:$0xff]   ;;  %v3186_v4 = vld [vmem:[#allocation5 + $0x524] ss:$16 sps:$4 sm:$0xff]  }
  0x7f   :  { %1853 = vmatprep.subr.bf16.mxu1 %v3105_v5  ;;  %v3189_v5 = vld [vmem:[#allocation5 + $0x724] ss:$16 sps:$4 sm:$0xff]  }
  0x80   :  { %1763 = vmatmul.mubr.bf16.vlgmr.msra.gmra.mxu0 %v3691_v6 }
  0x81   :  { %1804 = vmatmul.mubr.bf16.vlgmr.msra.gmra.mxu1 %v3693_v7  ;;  %1813 = vmatpush1.bf16.msra.mxu0 %v3100_v8  ;;  %v3184_v8 = vld [vmem:[#allocation5 + $0x520] ss:$16 sps:$4 sm:$0xff]  }
  0x82   :  { %1854 = vmatpush1.bf16.msra.mxu1 %v3103_v9  ;;  %1814 = vmatprep.subr.bf16.mxu0 %v3108_v10  ;;  %v3187_v9 = vld [vmem:[#allocation5 + $0x720] ss:$16 sps:$4 sm:$0xff]   ;;  %v3192_v10 = vld [vmem:[#allocation5 + $0x504] ss:$16 sps:$4 sm:$0xff]  }
  0x83   :  { %1855 = vmatprep.subr.bf16.mxu1 %v3111_v11  ;;  %1844 = vmatprep.mubr.bf16.mxu0 %v3703_v36  ;;  %v3195_v11 = vld [vmem:[#allocation5 + $0x704] ss:$16 sps:$4 sm:$0xff]  }
  0x84   :  { %1885 = vmatprep.mubr.bf16.mxu1 %v3707_v37 }
  0x85   :  { %1815 = vmatpush1.bf16.msra.mxu0 %v3106_v12  ;;  %v3190_v12 = vld [vmem:[#allocation5 + $0x500] ss:$16 sps:$4 sm:$0xff]  }
  0x86   :  { %1856 = vmatpush1.bf16.msra.mxu1 %v3109_v13  ;;  %1816 = vmatprep.subr.bf16.mxu0 %v3114_v14  ;;  %v3193_v13 = vld [vmem:[#allocation5 + $0x700] ss:$16 sps:$4 sm:$0xff]   ;;  %v3202_v14 = vld [vmem:[#allocation5 + $0x824] ss:$16 sps:$4 sm:$0xff]  }
  0x87   :  { %1857 = vmatprep.subr.bf16.mxu1 %v3117_v15  ;;  %v3205_v15 = vld [vmem:[#allocation5 + $0xec] ss:$16 sps:$4 sm:$0xff]  }
  0x89   :  { %1817 = vmatpush1.bf16.msra.mxu0 %v3112_v16  ;;  %v3713_v16 = vcombine.low %v3697_v32, %v3697_v32  ;;  %v3219_v32 = vld [vmem:[#allocation5 + $0x88] ss:$16 sps:$4 sm:$0xff]  }
  0x8a   :  { %1858 = vmatpush1.bf16.msra.mxu1 %v3115_v17  ;;  %1818 = vmatprep.subr.bf16.mxu0 %v3120_v18  ;;  %v3717_v17 = vcombine.low %v3699_v33, %v3699_v33  ;;  %v3200_v18 = vld [vmem:[#allocation5 + $0x820] ss:$16 sps:$4 sm:$0xff]   ;;  %v3222_v33 = vld [vmem:[#allocation5 + $0x2c8] ss:$16 sps:$4 sm:$0xff]  }
  0x8b   :  { %1859 = vmatprep.subr.bf16.mxu1 %v3123_v19  ;;  %v3203_v19 = vld [vmem:[#allocation5 + $0xe8] ss:$16 sps:$4 sm:$0xff]  }
  0x8d   :  { %1819 = vmatpush1.bf16.msra.mxu0 %v3118_v20  ;;  %v3208_v20 = vld [vmem:[#allocation5 + $0x804] ss:$16 sps:$4 sm:$0xff]  }
  0x8e   :  { %1860 = vmatpush1.bf16.msra.mxu1 %v3121_v21  ;;  %1820 = vmatprep.subr.bf16.mxu0 %v3126_v22  ;;  %v3211_v21 = vld [vmem:[#allocation5 + $0xcc] ss:$16 sps:$4 sm:$0xff]   ;;  %v3206_v22 = vld [vmem:[#allocation5 + $0x800] ss:$16 sps:$4 sm:$0xff]  }
  0x8f   :  { %1861 = vmatprep.subr.bf16.mxu1 %v3129_v23  ;;  %v3209_v23 = vld [vmem:[#allocation5 + $0xc8] ss:$16 sps:$4 sm:$0xff]  }
  0x91   :  { %1821 = vmatpush1.bf16.msra.mxu0 %v3124_v24  ;;  %v3215_v24 = vld [vmem:[#allocation5 + $0xac] ss:$16 sps:$4 sm:$0xff]  }
  0x92   :  { %1862 = vmatpush1.bf16.msra.mxu1 %v3127_v25  ;;  %1822 = vmatprep.subr.bf16.mxu0 %v3132_v26  ;;  %v3218_v25 = vld [vmem:[#allocation5 + $0x2ec] ss:$16 sps:$4 sm:$0xff]   ;;  %v3638_v26 = vmov 0  }
  0x93   :  { %1863 = vmatprep.subr.bf16.mxu1 %v3135_v27  ;;  %v3723_v27 = vld [vmem:[#allocation2 + $0x20] ss:$0 sps:$4 sm:$0xff]  }
  0x95   :  { %1823 = vmatpush1.bf16.msra.mxu0 %v3130_v28  ;;  %v3213_v28 = vld [vmem:[#allocation5 + $0xa8] ss:$16 sps:$4 sm:$0xff]  }
  0x96   :  { %1864 = vmatpush1.bf16.msra.mxu1 %v3133_v29  ;;  %1824 = vmatprep.subr.bf16.mxu0 %v3138_v30  ;;  %v3216_v29 = vld [vmem:[#allocation5 + $0x2e8] ss:$16 sps:$4 sm:$0xff]   ;;  %v3221_v30 = vld [vmem:[#allocation5 + $0x8c] ss:$16 sps:$4 sm:$0xff]  }
  0x97   :  { %1865 = vmatprep.subr.bf16.mxu1 %v3141_v31  ;;  %v3224_v31 = vld [vmem:[#allocation5 + $0x2cc] ss:$16 sps:$4 sm:$0xff]  }
  0x99   :  { %1825 = vmatpush1.bf16.msra.mxu0 %v3136_v34  ;;  %v3230_v34 = vld [vmem:[#allocation5 + $0x2ac] ss:$16 sps:$4 sm:$0xff]  }
  0x9a   :  { %1866 = vmatpush1.bf16.msra.mxu1 %v3139_v35  ;;  %1826 = vmatprep.subr.bf16.mxu0 %v3144_v38  ;;  %v3225_v35 = vld [vmem:[#allocation5 + $0x68] ss:$16 sps:$4 sm:$0xff]  }
  0x9b   :  { %1867 = vmatprep.subr.bf16.mxu1 %v3147_v39  ;;  %v3228_v38 = vld [vmem:[#allocation5 + $0x2a8] ss:$16 sps:$4 sm:$0xff]   ;;  %v3233_v39 = vld [vmem:[#allocation5 + $0x4c] ss:$16 sps:$4 sm:$0xff]  }
  0x9d   :  { %1827 = vmatpush1.bf16.msra.mxu0 %v3142_v40  ;;  %v3236_v40 = vld [vmem:[#allocation5 + $0x28c] ss:$16 sps:$4 sm:$0xff]  }
  0x9e   :  { %1868 = vmatpush1.bf16.msra.mxu1 %v3145_v41  ;;  %1828 = vmatprep.subr.bf16.mxu0 %v3150_v42  ;;  %v3231_v41 = vld [vmem:[#allocation5 + $0x48] ss:$16 sps:$4 sm:$0xff]  }
  0x9f   :  { %1869 = vmatprep.subr.bf16.mxu1 %v3153_v43  ;;  %v3234_v42 = vld [vmem:[#allocation5 + $0x288] ss:$16 sps:$4 sm:$0xff]   ;;  %v3239_v43 = vld [vmem:[#allocation5 + $0x2c] ss:$16 sps:$4 sm:$0xff]  }
  0xa1   :  { %1829 = vmatpush2.bf16.msra.mxu0 %v3148_v44  ;;  %v3242_v44 = vld [vmem:[#allocation5 + $0x26c] ss:$16 sps:$4 sm:$0xff]  }
  0xa2   :  { %1870 = vmatpush2.bf16.msra.mxu1 %v3151_v45  ;;  %1830 = vmatprep.subr.bf16.mxu0 %v3156_v46  ;;  %v3237_v45 = vld [vmem:[#allocation5 + $0x28] ss:$16 sps:$4 sm:$0xff]   ;;  %v3245_v46 = vld [vmem:[#allocation5 + $0xc] ss:$16 sps:$4 sm:$0xff]  }
  0xa3   :  { %1871 = vmatprep.subr.bf16.mxu1 %v3159_v48  ;;  %v3248_v48 = vld [vmem:[#allocation5 + $0x24c] ss:$16 sps:$4 sm:$0xff]  }
  0xa5   :  { %1831 = vmatpush2.bf16.msra.mxu0 %v3154_v49  ;;  %v3243_v49 = vld [vmem:[#allocation5 + $0x8] ss:$16 sps:$4 sm:$0xff]  }
  0xa6   :  { %1872 = vmatpush2.bf16.msra.mxu1 %v3157_v50  ;;  %1832 = vmatprep.subr.bf16.mxu0 %v3162_v52  ;;  %v3246_v50 = vld [vmem:[#allocation5 + $0x248] ss:$16 sps:$4 sm:$0xff]   ;;  %v3251_v52 = vld [vmem:[#allocation5 + $0x1ec] ss:$16 sps:$4 sm:$0xff]  }
  0xa7   :  { %1873 = vmatprep.subr.bf16.mxu1 %v3165_v53  ;;  %v3254_v53 = vld [vmem:[#allocation5 + $0x22c] ss:$16 sps:$4 sm:$0xff]  }
  0xa9   :  { %1833 = vmatpush2.bf16.msra.mxu0 %v3160_v54  ;;  %v3249_v54 = vld [vmem:[#allocation5 + $0x1e8] ss:$16 sps:$4 sm:$0xff]  }
  0xaa   :  { %1874 = vmatpush2.bf16.msra.mxu1 %v3163_v55  ;;  %1834 = vmatprep.subr.bf16.mxu0 %v3168_v56  ;;  %v3252_v55 = vld [vmem:[#allocation5 + $0x228] ss:$16 sps:$4 sm:$0xff]   ;;  %v3257_v56 = vld [vmem:[#allocation5 + $0x1cc] ss:$16 sps:$4 sm:$0xff]  }
  0xab   :  { %1875 = vmatprep.subr.bf16.mxu1 %v3171_v57  ;;  %v3260_v57 = vld [vmem:[#allocation5 + $0x20c] ss:$16 sps:$4 sm:$0xff]  }
  0xad   :  { %1835 = vmatpush2.bf16.msra.mxu0 %v3166_v58  ;;  %v3255_v58 = vld [vmem:[#allocation5 + $0x1c8] ss:$16 sps:$4 sm:$0xff]  }
  0xae   :  { %1876 = vmatpush2.bf16.msra.mxu1 %v3169_v59  ;;  %1836 = vmatprep.subr.bf16.mxu0 %v3174_v60  ;;  %v3258_v59 = vld [vmem:[#allocation5 + $0x208] ss:$16 sps:$4 sm:$0xff]   ;;  %v3263_v60 = vld [vmem:[#allocation5 + $0x1ac] ss:$16 sps:$4 sm:$0xff]  }
  0xaf   :  { %1877 = vmatprep.subr.bf16.mxu1 %v3177_v61  ;;  %v3266_v61 = vld [vmem:[#allocation5 + $0x3ec] ss:$16 sps:$4 sm:$0xff]  }
  0xb1   :  { %1837 = vmatpush2.bf16.msra.mxu0 %v3172_v62  ;;  %v3261_v62 = vld [vmem:[#allocation5 + $0x1a8] ss:$16 sps:$4 sm:$0xff]  }
  0xb2   :  { %1878 = vmatpush2.bf16.msra.mxu1 %v3175_v63  ;;  %1838 = vmatprep.subr.bf16.mxu0 %v3180_v0  ;;  %v3264_v63 = vld [vmem:[#allocation5 + $0x3e8] ss:$16 sps:$4 sm:$0xff]   ;;  %v3269_v0 = vld [vmem:[#allocation5 + $0x18c] ss:$16 sps:$4 sm:$0xff]  }
  0xb3   :  { %1879 = vmatprep.subr.bf16.mxu1 %v3183_v1  ;;  %v3272_v1 = vld [vmem:[#allocation5 + $0x3cc] ss:$16 sps:$4 sm:$0xff]  }
  0xb5   :  { %1839 = vmatpush2.bf16.msra.mxu0 %v3178_v2  ;;  %v3267_v2 = vld [vmem:[#allocation5 + $0x188] ss:$16 sps:$4 sm:$0xff]  }
  0xb6   :  { %1880 = vmatpush2.bf16.msra.mxu1 %v3181_v3  ;;  %1840 = vmatprep.subr.bf16.mxu0 %v3186_v4  ;;  %v3270_v3 = vld [vmem:[#allocation5 + $0x3c8] ss:$16 sps:$4 sm:$0xff]   ;;  %v3275_v4 = vld [vmem:[#allocation5 + $0x16c] ss:$16 sps:$4 sm:$0xff]  }
  0xb7   :  { %1881 = vmatprep.subr.bf16.mxu1 %v3189_v5  ;;  %v3278_v5 = vld [vmem:[#allocation5 + $0x3ac] ss:$16 sps:$4 sm:$0xff]  }
  0xb9   :  { %1841 = vmatpush2.bf16.msra.mxu0 %v3184_v8  ;;  %v3273_v8 = vld [vmem:[#allocation5 + $0x168] ss:$16 sps:$4 sm:$0xff]  }
  0xba   :  { %1882 = vmatpush2.bf16.msra.mxu1 %v3187_v9  ;;  %1842 = vmatprep.subr.bf16.mxu0 %v3192_v10  ;;  %v3276_v9 = vld [vmem:[#allocation5 + $0x3a8] ss:$16 sps:$4 sm:$0xff]   ;;  %v3281_v10 = vld [vmem:[#allocation5 + $0x14c] ss:$16 sps:$4 sm:$0xff]  }
  0xbb   :  { %1883 = vmatprep.subr.bf16.mxu1 %v3195_v11  ;;  %v3284_v11 = vld [vmem:[#allocation5 + $0x38c] ss:$16 sps:$4 sm:$0xff]  }
  0xbd   :  { %1843 = vmatpush2.bf16.msra.mxu0 %v3190_v12  ;;  %v3279_v12 = vld [vmem:[#allocation5 + $0x148] ss:$16 sps:$4 sm:$0xff]  }
  0xbe   :  { %1884 = vmatpush2.bf16.msra.mxu1 %v3193_v13  ;;  %1906 = vmatprep.subr.bf16.mxu0 %v3202_v14  ;;  %v3282_v13 = vld [vmem:[#allocation5 + $0x388] ss:$16 sps:$4 sm:$0xff]   ;;  %v3287_v14 = vld [vmem:[#allocation5 + $0x12c] ss:$16 sps:$4 sm:$0xff]  }
  0xbf   :  { %1935 = vmatprep.subr.bf16.mxu1 %v3205_v15  ;;  %v3290_v15 = vld [vmem:[#allocation5 + $0x36c] ss:$16 sps:$4 sm:$0xff]  }
  0xc0   :  { %1845 = vmatmul.mubr.bf16.vlgmr.msra.gmra.mxu0 %v3713_v16 }
  0xc1   :  { %1886 = vmatmul.mubr.bf16.vlgmr.msra.gmra.mxu1 %v3717_v17  ;;  %1907 = vmatpush1.bf16.msra.mxu0 %v3200_v18  ;;  %v3285_v18 = vld [vmem:[#allocation5 + $0x128] ss:$16 sps:$4 sm:$0xff]  }
  0xc2   :  { %1936 = vmatpush1.bf16.msra.mxu1 %v3203_v19  ;;  %1908 = vmatprep.subr.bf16.mxu0 %v3208_v20  ;;  %v3288_v19 = vld [vmem:[#allocation5 + $0x368] ss:$16 sps:$4 sm:$0xff]   ;;  %v3293_v20 = vld [vmem:[#allocation5 + $0x10c] ss:$16 sps:$4 sm:$0xff]  }
  0xc3   :  { %1937 = vmatprep.subr.bf16.mxu1 %v3211_v21  ;;  %1926 = vmatprep.mubr.bf16.mxu0 %v3638_v26  ;;  %v3296_v21 = vld [vmem:[#allocation5 + $0x34c] ss:$16 sps:$4 sm:$0xff]  }
  0xc4   :  { %1967 = vmatprep.mubr.bf16.mxu1 %v3685_v47  ;;  %v3227_v47 = vld [vmem:[#allocation5 + $0x6c] ss:$16 sps:$4 sm:$0xff]  }
  0xc5   :  { %1909 = vmatpush1.bf16.msra.mxu0 %v3206_v22  ;;  %v3291_v22 = vld [vmem:[#allocation5 + $0x108] ss:$16 sps:$4 sm:$0xff]  }
  0xc6   :  { %1938 = vmatpush1.bf16.msra.mxu1 %v3209_v23  ;;  %1976 = vmatprep.subr.bf16.mxu0 %v3218_v25  ;;  %v3294_v23 = vld [vmem:[#allocation5 + $0x348] ss:$16 sps:$4 sm:$0xff]   ;;  %v3302_v25 = vld [vmem:[#allocation5 + $0x4ec] ss:$16 sps:$4 sm:$0xff]  }
  0xc7   :  { %1939 = vmatprep.subr.bf16.mxu1 %v3215_v24  ;;  %v3299_v24 = vld [vmem:[#allocation5 + $0x32c] ss:$16 sps:$4 sm:$0xff]  }
  0xc8   :  { %2921 = vmatmul.mubr.msk.bf16.vlgmr.msra.gmra.mxu0 %vm1726_vm0, %v3723_v27 }
  0xc9   :  { %1977 = vmatpush1.bf16.msra.mxu0 %v3216_v29  ;;  %2008 = vmatprep.mubr.bf16.mxu0 %v3687_v51  ;;  %v3240_v51 = vld [vmem:[#allocation5 + $0x268] ss:$16 sps:$4 sm:$0xff]  }
  0xca   :  { %1940 = vmatpush1.bf16.msra.mxu1 %v3213_v28  ;;  %1978 = vmatprep.subr.bf16.mxu0 %v3224_v31  ;;  %v3297_v28 = vld [vmem:[#allocation5 + $0x328] ss:$16 sps:$4 sm:$0xff]   ;;  %v3308_v31 = vld [vmem:[#allocation5 + $0x4cc] ss:$16 sps:$4 sm:$0xff]  }
  0xcb   :  { %1941 = vmatprep.subr.bf16.mxu1 %v3221_v30  ;;  %v3300_v29 = vld [vmem:[#allocation5 + $0x4e8] ss:$16 sps:$4 sm:$0xff]   ;;  %v3305_v30 = vld [vmem:[#allocation5 + $0x30c] ss:$16 sps:$4 sm:$0xff]  }
  0xcd   :  { %1979 = vmatpush1.bf16.msra.mxu0 %v3222_v33  ;;  %v3306_v33 = vld [vmem:[#allocation5 + $0x4c8] ss:$16 sps:$4 sm:$0xff]  }
  0xce   :  { %1942 = vmatpush1.bf16.msra.mxu1 %v3219_v32  ;;  %1980 = vmatprep.subr.bf16.mxu0 %v3230_v34  ;;  %v3303_v32 = vld [vmem:[#allocation5 + $0x308] ss:$16 sps:$4 sm:$0xff]   ;;  %v3314_v34 = vld [vmem:[#allocation5 + $0x6ec] ss:$16 sps:$4 sm:$0xff]  }
  0xcf   :  { %1943 = vmatprep.subr.bf16.mxu1 %v3227_v47  ;;  %v3311_v47 = vld [vmem:[#allocation5 + $0x4ac] ss:$16 sps:$4 sm:$0xff]  }
  0xd1   :  { %1981 = vmatpush1.bf16.msra.mxu0 %v3228_v38  ;;  %v3312_v38 = vld [vmem:[#allocation5 + $0x6e8] ss:$16 sps:$4 sm:$0xff]  }
  0xd2   :  { %1944 = vmatpush1.bf16.msra.mxu1 %v3225_v35  ;;  %1982 = vmatprep.subr.bf16.mxu0 %v3236_v40  ;;  %v3309_v35 = vld [vmem:[#allocation5 + $0x4a8] ss:$16 sps:$4 sm:$0xff]   ;;  %v3320_v40 = vld [vmem:[#allocation5 + $0x6cc] ss:$16 sps:$4 sm:$0xff]  }
  0xd3   :  { %1945 = vmatprep.subr.bf16.mxu1 %v3233_v39  ;;  %v3317_v39 = vld [vmem:[#allocation5 + $0x48c] ss:$16 sps:$4 sm:$0xff]  }
  0xd5   :  { %1983 = vmatpush1.bf16.msra.mxu0 %v3234_v42  ;;  %v3318_v42 = vld [vmem:[#allocation5 + $0x6c8] ss:$16 sps:$4 sm:$0xff]  }
  0xd6   :  { %1946 = vmatpush1.bf16.msra.mxu1 %v3231_v41  ;;  %1984 = vmatprep.subr.bf16.mxu0 %v3242_v44  ;;  %v3315_v41 = vld [vmem:[#allocation5 + $0x488] ss:$16 sps:$4 sm:$0xff]  }
  0xd7   :  { %1947 = vmatprep.subr.bf16.mxu1 %v3239_v43  ;;  %v3326_v43 = vld [vmem:[#allocation5 + $0x6ac] ss:$16 sps:$4 sm:$0xff]   ;;  %v3321_v44 = vld [vmem:[#allocation5 + $0x468] ss:$16 sps:$4 sm:$0xff]  }
  0xd9   :  { %1985 = vmatpush1.bf16.msra.mxu0 %v3240_v51  ;;  %v3332_v51 = vld [vmem:[#allocation5 + $0x68c] ss:$16 sps:$4 sm:$0xff]  }
  0xda   :  { %1948 = vmatpush1.bf16.msra.mxu1 %v3237_v45  ;;  %1986 = vmatprep.subr.bf16.mxu0 %v3248_v48  ;;  %v3324_v45 = vld [vmem:[#allocation5 + $0x6a8] ss:$16 sps:$4 sm:$0xff]   ;;  %v3335_v48 = vld [vmem:[#allocation5 + $0x42c] ss:$16 sps:$4 sm:$0xff]  }
  0xdb   :  { %1949 = vmatprep.subr.bf16.mxu1 %v3245_v46  ;;  %v3327_v46 = vld [vmem:[#allocation5 + $0x448] ss:$16 sps:$4 sm:$0xff]  }
  0xdd   :  { %1987 = vmatpush1.bf16.msra.mxu0 %v3246_v50  ;;  %v3333_v50 = vld [vmem:[#allocation5 + $0x428] ss:$16 sps:$4 sm:$0xff]  }
  0xde   :  { %1950 = vmatpush1.bf16.msra.mxu1 %v3243_v49  ;;  %1988 = vmatprep.subr.bf16.mxu0 %v3254_v53  ;;  %v3338_v49 = vld [vmem:[#allocation5 + $0x66c] ss:$16 sps:$4 sm:$0xff]  }
  0xdf   :  { %1951 = vmatprep.subr.bf16.mxu1 %v3251_v52  ;;  %v3336_v52 = vld [vmem:[#allocation5 + $0x668] ss:$16 sps:$4 sm:$0xff]   ;;  %v3344_v53 = vld [vmem:[#allocation5 + $0x64c] ss:$16 sps:$4 sm:$0xff]  }
  0xe1   :  { %1989 = vmatpush1.bf16.msra.mxu0 %v3252_v55  ;;  %v3342_v55 = vld [vmem:[#allocation5 + $0x648] ss:$16 sps:$4 sm:$0xff]  }
  0xe2   :  { %1952 = vmatpush2.bf16.msra.mxu1 %v3249_v54  ;;  %1990 = vmatprep.subr.bf16.mxu0 %v3260_v57  ;;  %v3339_v54 = vld [vmem:[#allocation5 + $0x408] ss:$16 sps:$4 sm:$0xff]   ;;  %v3350_v57 = vld [vmem:[#allocation5 + $0x62c] ss:$16 sps:$4 sm:$0xff]  }
  0xe3   :  { %1953 = vmatprep.subr.bf16.mxu1 %v3257_v56  ;;  %v3347_v56 = vld [vmem:[#allocation5 + $0x5ec] ss:$16 sps:$4 sm:$0xff]  }
  0xe5   :  { %1991 = vmatpush1.bf16.msra.mxu0 %v3258_v59  ;;  %v3348_v59 = vld [vmem:[#allocation5 + $0x628] ss:$16 sps:$4 sm:$0xff]  }
  0xe6   :  { %1954 = vmatpush2.bf16.msra.mxu1 %v3255_v58  ;;  %1992 = vmatprep.subr.bf16.mxu0 %v3266_v61  ;;  %v3345_v58 = vld [vmem:[#allocation5 + $0x5e8] ss:$16 sps:$4 sm:$0xff]   ;;  %v3356_v61 = vld [vmem:[#allocation5 + $0x60c] ss:$16 sps:$4 sm:$0xff]  }
  0xe7   :  { %1955 = vmatprep.subr.bf16.mxu1 %v3263_v60  ;;  %v3353_v60 = vld [vmem:[#allocation5 + $0x5cc] ss:$16 sps:$4 sm:$0xff]  }
  0xe9   :  { %1993 = vmatpush2.bf16.msra.mxu0 %v3264_v63  ;;  %v3354_v63 = vld [vmem:[#allocation5 + $0x608] ss:$16 sps:$4 sm:$0xff]  }
  0xea   :  { %1956 = vmatpush2.bf16.msra.mxu1 %v3261_v62  ;;  %1994 = vmatprep.subr.bf16.mxu0 %v3272_v1  ;;  %v3351_v62 = vld [vmem:[#allocation5 + $0x5c8] ss:$16 sps:$4 sm:$0xff]   ;;  %v3362_v1 = vld [vmem:[#allocation5 + $0x7ec] ss:$16 sps:$4 sm:$0xff]  }
  0xeb   :  { %1957 = vmatprep.subr.bf16.mxu1 %v3269_v0  ;;  %v3359_v0 = vld [vmem:[#allocation5 + $0x5ac] ss:$16 sps:$4 sm:$0xff]  }
  0xed   :  { %1995 = vmatpush2.bf16.msra.mxu0 %v3270_v3  ;;  %v3360_v3 = vld [vmem:[#allocation5 + $0x7e8] ss:$16 sps:$4 sm:$0xff]  }
  0xee   :  { %1958 = vmatpush2.bf16.msra.mxu1 %v3267_v2  ;;  %1996 = vmatprep.subr.bf16.mxu0 %v3278_v5  ;;  %v3357_v2 = vld [vmem:[#allocation5 + $0x5a8] ss:$16 sps:$4 sm:$0xff]   ;;  %v3368_v5 = vld [vmem:[#allocation5 + $0x7cc] ss:$16 sps:$4 sm:$0xff]  }
  0xef   :  { %1959 = vmatprep.subr.bf16.mxu1 %v3275_v4  ;;  %v3365_v4 = vld [vmem:[#allocation5 + $0x58c] ss:$16 sps:$4 sm:$0xff]  }
  0xf1   :  { %1997 = vmatpush2.bf16.msra.mxu0 %v3276_v9  ;;  %v3366_v9 = vld [vmem:[#allocation5 + $0x7c8] ss:$16 sps:$4 sm:$0xff]  }
  0xf2   :  { %1960 = vmatpush2.bf16.msra.mxu1 %v3273_v8  ;;  %1998 = vmatprep.subr.bf16.mxu0 %v3284_v11  ;;  %v3363_v8 = vld [vmem:[#allocation5 + $0x588] ss:$16 sps:$4 sm:$0xff]   ;;  %v3374_v11 = vld [vmem:[#allocation5 + $0x7ac] ss:$16 sps:$4 sm:$0xff]  }
  0xf3   :  { %1961 = vmatprep.subr.bf16.mxu1 %v3281_v10  ;;  %v3371_v10 = vld [vmem:[#allocation5 + $0x56c] ss:$16 sps:$4 sm:$0xff]  }
  0xf5   :  { %1999 = vmatpush2.bf16.msra.mxu0 %v3282_v13  ;;  %v3372_v13 = vld [vmem:[#allocation5 + $0x7a8] ss:$16 sps:$4 sm:$0xff]  }
  0xf6   :  { %1962 = vmatpush2.bf16.msra.mxu1 %v3279_v12  ;;  %2000 = vmatprep.subr.bf16.mxu0 %v3290_v15  ;;  %v3369_v12 = vld [vmem:[#allocation5 + $0x568] ss:$16 sps:$4 sm:$0xff]   ;;  %v3380_v15 = vld [vmem:[#allocation5 + $0x78c] ss:$16 sps:$4 sm:$0xff]  }
  0xf7   :  { %1963 = vmatprep.subr.bf16.mxu1 %v3287_v14  ;;  %v3377_v14 = vld [vmem:[#allocation5 + $0x54c] ss:$16 sps:$4 sm:$0xff]  }
  0xf9   :  { %2001 = vmatpush2.bf16.msra.mxu0 %v3288_v19  ;;  %v3378_v19 = vld [vmem:[#allocation5 + $0x788] ss:$16 sps:$4 sm:$0xff]  }
  0xfa   :  { %1964 = vmatpush2.bf16.msra.mxu1 %v3285_v18  ;;  %2002 = vmatprep.subr.bf16.mxu0 %v3296_v21  ;;  %v3375_v18 = vld [vmem:[#allocation5 + $0x548] ss:$16 sps:$4 sm:$0xff]   ;;  %v3383_v21 = vld [vmem:[#allocation5 + $0x52c] ss:$16 sps:$4 sm:$0xff]  }
  0xfb   :  { %1965 = vmatprep.subr.bf16.mxu1 %v3293_v20  ;;  %v355_v20 = vlaneseq }
  0xfd   :  { %2003 = vmatpush2.bf16.msra.mxu0 %v3294_v23  ;;  %v3381_v23 = vld [vmem:[#allocation5 + $0x528] ss:$16 sps:$4 sm:$0xff]  }
  0xfe   :  { %1966 = vmatpush2.bf16.msra.mxu1 %v3291_v22  ;;  %2004 = vmatprep.subr.bf16.mxu0 %v3299_v24  ;;  %v3386_v22 = vld [vmem:[#allocation5 + $0x76c] ss:$16 sps:$4 sm:$0xff]   ;;  %v3384_v24 = vld [vmem:[#allocation5 + $0x768] ss:$16 sps:$4 sm:$0xff]  }
  0xff   :  { %2017 = vmatprep.subr.bf16.mxu1 %v3302_v25  ;;  %v3732_v25 = vshrl.u32 %v355_v20, 7  ;;  %v3473_v20 = vld [vmem:[#allocation8 + $0x114] ss:$8 sps:$4 sm:$0xff]  }
 0x101   :  { %1968 = vmatmul.mubr.bf16.vlgmr.msra.gmra.mxu1 %v3691_v6  ;;  %2005 = vmatpush2.bf16.msra.mxu0 %v3297_v28  ;;  %v3323_v6 = vld [vmem:[#allocation5 + $0x46c] ss:$16 sps:$4 sm:$0xff]  }
 0x102   :  { %2018 = vmatpush1.bf16.msra.mxu1 %v3300_v29  ;;  %2006 = vmatprep.subr.bf16.mxu0 %v3305_v30  ;;  %v3389_v28 = vld [vmem:[#allocation5 + $0x50c] ss:$16 sps:$4 sm:$0xff]   ;;  %v3387_v30 = vld [vmem:[#allocation5 + $0x508] ss:$16 sps:$4 sm:$0xff]  }
 0x103   :  { %2019 = vmatprep.subr.bf16.mxu1 %v3308_v31  ;;  %2049 = vmatprep.mubr.bf16.mxu1 %v3703_v36  ;;  %v3329_v36 = vld [vmem:[#allocation5 + $0x44c] ss:$16 sps:$4 sm:$0xff]   ;;  %v3390_v31 = vld [vmem:[#allocation5 + $0x748] ss:$16 sps:$4 sm:$0xff]  }
 0x104   :  { %v3392_v29 = vld [vmem:[#allocation5 + $0x74c] ss:$16 sps:$4 sm:$0xff]  }
 0x105   :  { %2007 = vmatpush2.bf16.msra.mxu0 %v3303_v32  ;;  %v357_v32 = vsub.s32 0, %v3732_v25 }
 0x106   :  { %2020 = vmatpush1.bf16.msra.mxu1 %v3306_v33  ;;  %2058 = vmatprep.subr.bf16.mxu0 %v3314_v34  ;;  %v3735_v33 = vld [vmem:[#allocation7] sm:$0xf]  ;;  %v3398_v34 = vld [vmem:[#allocation5 + $0x82c] ss:$16 sps:$4 sm:$0xff]  }
 0x107   :  { %2021 = vmatprep.subr.bf16.mxu1 %v3311_v47  ;;  %v3395_v47 = vld [vmem:[#allocation5 + $0x72c] ss:$16 sps:$4 sm:$0xff]  }
 0x108   :  { %2009 = vmatmul.mubr.bf16.vlgmr.msra.gmra.mxu0 %v3693_v7  ;;  %v3330_v7 = vld [vmem:[#allocation5 + $0x688] ss:$16 sps:$4 sm:$0xff]  }
 0x109   :  { %2059 = vmatpush1.bf16.msra.mxu0 %v3312_v38  ;;  %2090 = vmatprep.mubr.bf16.mxu0 %v3707_v37  ;;  %v3341_v37 = vld [vmem:[#allocation5 + $0x40c] ss:$16 sps:$4 sm:$0xff]   ;;  %v358_v38 = vrot.slane %v3735_v33, %v357_v32 }
 0x10a   :  { %2022 = vmatpush1.bf16.msra.mxu1 %v3309_v35  ;;  %2060 = vmatprep.subr.bf16.mxu0 %v3320_v40  ;;  %v361_v35 = vsub.s32 1, %v3732_v25  ;;  %v3396_v40 = vld [vmem:[#allocation5 + $0x828] ss:$16 sps:$4 sm:$0xff]  }
 0x10b   :  { %2023 = vmatprep.subr.bf16.mxu1 %v3317_v39  ;;  %v3393_v39 = vld [vmem:[#allocation5 + $0x728] ss:$16 sps:$4 sm:$0xff]  }
 0x10d   :  { %2061 = vmatpush1.bf16.msra.mxu0 %v3318_v42  ;;  %v3404_v42 = vld [vmem:[#allocation5 + $0x80c] ss:$16 sps:$4 sm:$0xff]  }
 0x10e   :  { %2024 = vmatpush1.bf16.msra.mxu1 %v3315_v41  ;;  %2062 = vmatprep.subr.bf16.mxu0 %v3326_v43  ;;  %v3401_v41 = vld [vmem:[#allocation5 + $0x70c] ss:$16 sps:$4 sm:$0xff]  }
 0x10f   :  { %2025 = vmatprep.subr.bf16.mxu1 %v3323_v6  ;;  %v362_v6 = vrot.slane %v3735_v33, %v361_v35 }
 0x111   :  { %2063 = vmatpush1.bf16.msra.mxu0 %v3324_v45 }
 0x112   :  { %2026 = vmatpush1.bf16.msra.mxu1 %v3321_v44  ;;  %2064 = vmatprep.subr.bf16.mxu0 %v3332_v51  ;;  %v3402_v51 = vld [vmem:[#allocation5 + $0x808] ss:$16 sps:$4 sm:$0xff]  }
 0x113   :  { %2027 = vmatprep.subr.bf16.mxu1 %v3329_v36  ;;  %v3399_v36 = vld [vmem:[#allocation5 + $0x708] ss:$16 sps:$4 sm:$0xff]  }
 0x115   :  { %2065 = vmatpush1.bf16.msra.mxu0 %v3330_v7 }
 0x116   :  { %2028 = vmatpush1.bf16.msra.mxu1 %v3327_v46  ;;  %2066 = vmatprep.subr.bf16.mxu0 %v3338_v49 }
 0x117   :  { %2029 = vmatprep.subr.bf16.mxu1 %v3335_v48  ;;  %v3407_v48 = vld [vmem:[#allocation8 + $0x74] ss:$8 sps:$4 sm:$0xff]  }
 0x119   :  { %2067 = vmatpush1.bf16.msra.mxu0 %v3336_v52 }
 0x11a   :  { %2030 = vmatpush1.bf16.msra.mxu1 %v3333_v50  ;;  %2068 = vmatprep.subr.bf16.mxu0 %v3344_v53 }
 0x11b   :  { %2031 = vmatprep.subr.bf16.mxu1 %v3341_v37 }
 0x11d   :  { %2069 = vmatpush1.bf16.msra.mxu0 %v3342_v55 }
 0x11e   :  { %2032 = vmatpush1.bf16.msra.mxu1 %v3339_v54  ;;  %2070 = vmatprep.subr.bf16.mxu0 %v3350_v57  ;;  %v3408_v57 = vld [vmem:[#allocation8 + $0x60] ss:$8 sps:$4 sm:$0xff]  }
 0x11f   :  { %2033 = vmatprep.subr.bf16.mxu1 %v3347_v56  ;;  %v3410_v56 = vld [vmem:[#allocation8 + $0x64] ss:$8 sps:$4 sm:$0xff]  }
 0x121   :  { %2071 = vmatpush1.bf16.msra.mxu0 %v3348_v59  ;;  %v3416_v59 = vld [vmem:[#allocation8 + $0x44] ss:$8 sps:$4 sm:$0xff]  }
 0x122   :  { %2034 = vmatpush2.bf16.msra.mxu1 %v3345_v58  ;;  %2072 = vmatprep.subr.bf16.mxu0 %v3356_v61  ;;  %v3411_v58 = vld [vmem:[#allocation8 + $0x50] ss:$8 sps:$4 sm:$0xff]   ;;  %v3455_v61 = vld [vmem:[#allocation8 + $0x174] ss:$8 sps:$4 sm:$0xff]  }
 0x123   :  { %2035 = vmatprep.subr.bf16.mxu1 %v3353_v60  ;;  %v3453_v60 = vld [vmem:[#allocation8 + $0x170] ss:$8 sps:$4 sm:$0xff]  }
 0x125   :  { %2073 = vmatpush1.bf16.msra.mxu0 %v3354_v63  ;;  %v3414_v63 = vld [vmem:[#allocation8 + $0x40] ss:$8 sps:$4 sm:$0xff]  }
 0x126   :  { %2036 = vmatpush2.bf16.msra.mxu1 %v3351_v62  ;;  %2074 = vmatprep.subr.bf16.mxu0 %v3362_v1  ;;  %v3458_v62 = vld [vmem:[#allocation8 + $0x164] ss:$8 sps:$4 sm:$0xff]   ;;  %v3417_v1 = vld [vmem:[#allocation8 + $0x30] ss:$8 sps:$4 sm:$0xff]  }
 0x127   :  { %2037 = vmatprep.subr.bf16.mxu1 %v3359_v0  ;;  %v3456_v0 = vld [vmem:[#allocation8 + $0x160] ss:$8 sps:$4 sm:$0xff]  }
 0x129   :  { %2075 = vmatpush2.bf16.msra.mxu0 %v3360_v3  ;;  %v3422_v3 = vld [vmem:[#allocation8 + $0x24] ss:$8 sps:$4 sm:$0xff]  }
 0x12a   :  { %2038 = vmatpush2.bf16.msra.mxu1 %v3357_v2  ;;  %2076 = vmatprep.subr.bf16.mxu0 %v3368_v5  ;;  %v3459_v2 = vld [vmem:[#allocation8 + $0x150] ss:$8 sps:$4 sm:$0xff]   ;;  %v3420_v5 = vld [vmem:[#allocation8 + $0x20] ss:$8 sps:$4 sm:$0xff]  }
 0x12b   :  { %2039 = vmatprep.subr.bf16.mxu1 %v3365_v4  ;;  %v3464_v4 = vld [vmem:[#allocation8 + $0x144] ss:$8 sps:$4 sm:$0xff]  }
 0x12d   :  { %2077 = vmatpush2.bf16.msra.mxu0 %v3366_v9  ;;  %v3425_v9 = vld [vmem:[#allocation8 + $0x14] ss:$8 sps:$4 sm:$0xff]  }
 0x12e   :  { %2040 = vmatpush2.bf16.msra.mxu1 %v3363_v8  ;;  %2078 = vmatprep.subr.bf16.mxu0 %v3374_v11  ;;  %v3462_v8 = vld [vmem:[#allocation8 + $0x140] ss:$8 sps:$4 sm:$0xff]   ;;  %v3423_v11 = vld [vmem:[#allocation8 + $0x10] ss:$8 sps:$4 sm:$0xff]  }
 0x12f   :  { %2041 = vmatprep.subr.bf16.mxu1 %v3371_v10  ;;  %v3467_v10 = vld [vmem:[#allocation8 + $0x134] ss:$8 sps:$4 sm:$0xff]  }
 0x131   :  { %2079 = vmatpush2.bf16.msra.mxu0 %v3372_v13  ;;  %v3428_v13 = vld [vmem:[#allocation8 + $0x4] ss:$8 sps:$4 sm:$0xff]  }
 0x132   :  { %2042 = vmatpush2.bf16.msra.mxu1 %v3369_v12  ;;  %2080 = vmatprep.subr.bf16.mxu0 %v3380_v15  ;;  %v3465_v12 = vld [vmem:[#allocation8 + $0x130] ss:$8 sps:$4 sm:$0xff]   ;;  %v3426_v15 = vld [vmem:[#allocation8] ss:$8 sps:$4 sm:$0xff]  }
 0x133   :  { %2043 = vmatprep.subr.bf16.mxu1 %v3377_v14  ;;  %v3470_v14 = vld [vmem:[#allocation8 + $0x124] ss:$8 sps:$4 sm:$0xff]  }
 0x135   :  { %2081 = vmatpush2.bf16.msra.mxu0 %v3378_v19  ;;  %v3431_v19 = vld [vmem:[#allocation8 + $0xf4] ss:$8 sps:$4 sm:$0xff]  }
 0x136   :  { %2044 = vmatpush2.bf16.msra.mxu1 %v3375_v18  ;;  %2082 = vmatprep.subr.bf16.mxu0 %v3386_v22  ;;  %v3468_v18 = vld [vmem:[#allocation8 + $0x120] ss:$8 sps:$4 sm:$0xff]   ;;  %v3471_v22 = vld [vmem:[#allocation8 + $0x110] ss:$8 sps:$4 sm:$0xff]  }
 0x137   :  { %2045 = vmatprep.subr.bf16.mxu1 %v3383_v21  ;;  %v3429_v21 = vld [vmem:[#allocation8 + $0xf0] ss:$8 sps:$4 sm:$0xff]  }
 0x139   :  { %2083 = vmatpush2.bf16.msra.mxu0 %v3384_v24  ;;  %v3476_v24 = vld [vmem:[#allocation8 + $0x104] ss:$8 sps:$4 sm:$0xff]  }
 0x13a   :  { %2046 = vmatpush2.bf16.msra.mxu1 %v3381_v23  ;;  %2084 = vmatprep.subr.bf16.mxu0 %v3392_v29  ;;  %v3434_v23 = vld [vmem:[#allocation8 + $0xe4] ss:$8 sps:$4 sm:$0xff]   ;;  %v3474_v29 = vld [vmem:[#allocation8 + $0x100] ss:$8 sps:$4 sm:$0xff]  }
 0x13b   :  { %2047 = vmatprep.subr.bf16.mxu1 %v3389_v28  ;;  %v3432_v28 = vld [vmem:[#allocation8 + $0xe0] ss:$8 sps:$4 sm:$0xff]  }
 0x13d   :  { %2085 = vmatpush2.bf16.msra.mxu0 %v3390_v31  ;;  %v3479_v31 = vld [vmem:[#allocation8 + $0x1f4] ss:$8 sps:$4 sm:$0xff]  }
 0x13e   :  { %2048 = vmatpush2.bf16.msra.mxu1 %v3387_v30  ;;  %2086 = vmatprep.subr.bf16.mxu0 %v3395_v47  ;;  %v3437_v30 = vld [vmem:[#allocation8 + $0xd4] ss:$8 sps:$4 sm:$0xff]   ;;  %v3435_v47 = vld [vmem:[#allocation8 + $0xd0] ss:$8 sps:$4 sm:$0xff]  }
 0x13f   :  { %2111 = vmatprep.subr.bf16.mxu1 %v3398_v34  ;;  %v3477_v34 = vld [vmem:[#allocation8 + $0x1f0] ss:$8 sps:$4 sm:$0xff]  }
 0x140   :  { %v1764_v43 = vpop.f32.mrf.mxu0 }
 0x141   :  { %v1805_v44 = vpop.f32.mrf.mxu1  ;;  %2050 = vmatmul.mubr.bf16.vlgmr.msra.gmra.mxu1 %v3713_v16  ;;  %v1765_v45 = vadd.f32 %v1764_v43, %v358_v38  ;;  %2087 = vmatpush2.bf16.msra.mxu0 %v3393_v39  ;;  %v3405_v16 = vld [vmem:[#allocation8 + $0x70] ss:$8 sps:$4 sm:$0xff]   ;;  %v3440_v38 = vld [vmem:[#allocation8 + $0xc4] ss:$8 sps:$4 sm:$0xff]  }
 0x142   :  { %2112 = vmatpush1.bf16.msra.mxu1 %v3396_v40  ;;  %v1766_v46 = vpop.f32.mrf.mxu0  ;;  %2088 = vmatprep.subr.bf16.mxu0 %v3401_v41  ;;  %v3482_v39 = vld [vmem:[#allocation8 + $0x1e4] ss:$8 sps:$4 sm:$0xff]   ;;  %v3438_v40 = vld [vmem:[#allocation8 + $0xc0] ss:$8 sps:$4 sm:$0xff]   ;;  %v3441_v43 = vld [vmem:[#allocation8 + $0xb0] ss:$8 sps:$4 sm:$0xff]  }
 0x143   :  { %v1807_v7 = vpop.f32.mrf.mxu1  ;;  %2113 = vmatprep.subr.bf16.mxu1 %v3404_v42  ;;  %v3745_v49 = vadd.f32 %v1805_v44, %v1765_v45  ;;  %v1767_v50 = vadd.f32 %v1766_v46, %v362_v6  ;;  %2131 = vmatprep.mubr.bf16.mxu1 %v3638_v26  ;;  %v3413_v26 = vld [vmem:[#allocation8 + $0x54] ss:$8 sps:$4 sm:$0xff]   ;;  %v3480_v41 = vld [vmem:[#allocation8 + $0x1e0] ss:$8 sps:$4 sm:$0xff]   ;;  %v3483_v44 = vld [vmem:[#allocation8 + $0x1d0] ss:$8 sps:$4 sm:$0xff]  }
 0x144   :  { %v1768_v52 = vpop.f32.mrf.mxu0  ;;  %v3443_v42 = vld [vmem:[#allocation8 + $0xb4] ss:$8 sps:$4 sm:$0xff]   ;;  %v3446_v45 = vld [vmem:[#allocation8 + $0xa4] ss:$8 sps:$4 sm:$0xff]   ;;  %v3486_v46 = vld [vmem:[#allocation8 + $0x1c0] ss:$8 sps:$4 sm:$0xff]  }
 0x145   :  { %v1809_v37 = vpop.f32.mrf.mxu1  ;;  %v3748_v53 = vadd.f32 %v1807_v7, %v1767_v50  ;;  %2089 = vmatpush2.bf16.msra.mxu0 %v3399_v36  ;;  %v3485_v6 = vld [vmem:[#allocation8 + $0x1d4] ss:$8 sps:$4 sm:$0xff]   ;;  %v3488_v36 = vld [vmem:[#allocation8 + $0x1c4] ss:$8 sps:$4 sm:$0xff]  }
 0x146   :  { %2114 = vmatpush1.bf16.msra.mxu1 %v3402_v51  ;;  %v1769_v54 = vpop.f32.mrf.mxu0  ;;  %2540 = vmatprep.subr.bf16.mxu0 %v3407_v48  ;;  %v3444_v51 = vld [vmem:[#allocation8 + $0xa0] ss:$8 sps:$4 sm:$0xff]   ;;  %v3449_v7 = vld [vmem:[#allocation8 + $0x94] ss:$8 sps:$4 sm:$0xff]   ;;  %v3447_v48 = vld [vmem:[#allocation8 + $0x90] ss:$8 sps:$4 sm:$0xff]  }
 0x147   :  { %v1810_v55 = vpop.f32.mrf.mxu1  ;;  %2581 = vmatprep.subr.bf16.mxu1 %v3455_v61  ;;  %v3452_v50 = vld [vmem:[#allocation8 + $0x84] ss:$8 sps:$4 sm:$0xff]   ;;  %v3450_v54 = vld [vmem:[#allocation8 + $0x80] ss:$8 sps:$4 sm:$0xff]  }
 0x148   :  { %2091 = vmatmul.mubr.bf16.vlgmr.msra.gmra.mxu0 %v3717_v17  ;;  %v3419_v17 = vld [vmem:[#allocation8 + $0x34] ss:$8 sps:$4 sm:$0xff]   ;;  %v3489_v55 = vld [vmem:[#allocation8 + $0x1b0] ss:$8 sps:$4 sm:$0xff]  }
 0x149   :  { %2922 = vmatmul.mubr.msk.bf16.vlgmr.msra.gmra.mxu1 %vm1726_vm0, %v3723_v27  ;;  %2541 = vmatpush1.bf16.msra.mxu0 %v3405_v16  ;;  %v3461_v27 = vld [vmem:[#allocation8 + $0x154] ss:$8 sps:$4 sm:$0xff]  }
 0x14a   :  { %2542 = vmatprep.subr.bf16.mxu0 %v3410_v56  ;;  %2582 = vmatpush1.bf16.msra.mxu1 %v3453_v60  ;;  %v3491_v16 = vld [vmem:[#allocation8 + $0x1b4] ss:$8 sps:$4 sm:$0xff]   ;;  %v3494_v60 = vld [vmem:[#allocation8 + $0x1a4] ss:$8 sps:$4 sm:$0xff]  }
 0x14b   :  { %2583 = vmatprep.subr.bf16.mxu1 %v3458_v62  ;;  %v3492_v62 = vld [vmem:[#allocation8 + $0x1a0] ss:$8 sps:$4 sm:$0xff]  }
 0x14d   :  { %2543 = vmatpush1.bf16.msra.mxu0 %v3408_v57 }
 0x14e   :  { %2544 = vmatprep.subr.bf16.mxu0 %v3413_v26  ;;  %2584 = vmatpush1.bf16.msra.mxu1 %v3456_v0 }
 0x14f   :  { %2585 = vmatprep.subr.bf16.mxu1 %v3461_v27 }
 0x151   :  { %2545 = vmatpush1.bf16.msra.mxu0 %v3411_v58 }
 0x152   :  { %2546 = vmatprep.subr.bf16.mxu0 %v3416_v59  ;;  %2586 = vmatpush1.bf16.msra.mxu1 %v3459_v2 }
 0x153   :  { %2587 = vmatprep.subr.bf16.mxu1 %v3464_v4 }
 0x155   :  { %2547 = vmatpush1.bf16.msra.mxu0 %v3414_v63 }
 0x156   :  { %2548 = vmatprep.subr.bf16.mxu0 %v3419_v17  ;;  %2588 = vmatpush1.bf16.msra.mxu1 %v3462_v8 }
 0x157   :  { %2589 = vmatprep.subr.bf16.mxu1 %v3467_v10 }
 0x159   :  { %2549 = vmatpush1.bf16.msra.mxu0 %v3417_v1  ;;  %v3497_v1 = vld [vmem:[#allocation8 + $0x194] ss:$8 sps:$4 sm:$0xff]  }
 0x15a   :  { %2550 = vmatprep.subr.bf16.mxu0 %v3422_v3  ;;  %2590 = vmatpush1.bf16.msra.mxu1 %v3465_v12  ;;  %v3495_v3 = vld [vmem:[#allocation8 + $0x190] ss:$8 sps:$4 sm:$0xff]  }
 0x15b   :  { %2591 = vmatprep.subr.bf16.mxu1 %v3470_v14 }
 0x15d   :  { %2551 = vmatpush1.bf16.msra.mxu0 %v3420_v5 }
 0x15e   :  { %2552 = vmatprep.subr.bf16.mxu0 %v3425_v9  ;;  %2592 = vmatpush1.bf16.msra.mxu1 %v3468_v18  ;;  %v3500_v9 = vld [vmem:[#allocation8 + $0x184] ss:$8 sps:$4 sm:$0xff]  }
 0x15f   :  { %2593 = vmatprep.subr.bf16.mxu1 %v3473_v20 }
 0x161   :  { %2553 = vmatpush1.bf16.msra.mxu0 %v3423_v11 }
 0x162   :  { %2554 = vmatprep.subr.bf16.mxu0 %v3428_v13  ;;  %2594 = vmatpush1.bf16.msra.mxu1 %v3471_v22 }
 0x163   :  { %2595 = vmatprep.subr.bf16.mxu1 %v3476_v24  ;;  %v369_v24 = vsub.s32 3, %v3732_v25 }
 0x165   :  { %2555 = vmatpush1.bf16.msra.mxu0 %v3426_v15 }
 0x166   :  { %2556 = vmatprep.subr.bf16.mxu0 %v3431_v19  ;;  %2596 = vmatpush1.bf16.msra.mxu1 %v3474_v29 }
 0x167   :  { %2597 = vmatprep.subr.bf16.mxu1 %v3479_v31 }
 0x169   :  { %2557 = vmatpush2.bf16.msra.mxu0 %v3429_v21 }
 0x16a   :  { %2558 = vmatprep.subr.bf16.mxu0 %v3434_v23  ;;  %2598 = vmatpush2.bf16.msra.mxu1 %v3477_v34  ;;  %v365_v23 = vsub.s32 2, %v3732_v25 }
 0x16b   :  { %2599 = vmatprep.subr.bf16.mxu1 %v3482_v39 }
 0x16d   :  { %2559 = vmatpush2.bf16.msra.mxu0 %v3432_v28  ;;  %v366_v28 = vrot.slane %v3735_v33, %v365_v23 }
 0x16e   :  { %2560 = vmatprep.subr.bf16.mxu0 %v3437_v30  ;;  %2600 = vmatpush2.bf16.msra.mxu1 %v3480_v41  ;;  %v370_v30 = vrot.slane %v3735_v33, %v369_v24 }
 0x16f   :  { %2601 = vmatprep.subr.bf16.mxu1 %v3485_v6 }
 0x171   :  { %2561 = vmatpush2.bf16.msra.mxu0 %v3435_v47 }
 0x172   :  { %2562 = vmatprep.subr.bf16.mxu0 %v3440_v38  ;;  %2602 = vmatpush2.bf16.msra.mxu1 %v3483_v44 }
 0x173   :  { %2603 = vmatprep.subr.bf16.mxu1 %v3488_v36 }
 0x175   :  { %2563 = vmatpush2.bf16.msra.mxu0 %v3438_v40 }
 0x176   :  { %2564 = vmatprep.subr.bf16.mxu0 %v3443_v42  ;;  %2604 = vmatpush2.bf16.msra.mxu1 %v3486_v46 }
 0x177   :  { %2605 = vmatprep.subr.bf16.mxu1 %v3491_v16 }
 0x179   :  { %2565 = vmatpush2.bf16.msra.mxu0 %v3441_v43 }
 0x17a   :  { %2566 = vmatprep.subr.bf16.mxu0 %v3446_v45  ;;  %2606 = vmatpush2.bf16.msra.mxu1 %v3489_v55 }
 0x17b   :  { %2607 = vmatprep.subr.bf16.mxu1 %v3494_v60 }
 0x17d   :  { %2567 = vmatpush2.bf16.msra.mxu0 %v3444_v51 }
 0x17e   :  { %2568 = vmatprep.subr.bf16.mxu0 %v3449_v7  ;;  %2608 = vmatpush2.bf16.msra.mxu1 %v3492_v62 }
 0x17f   :  { %2609 = vmatprep.subr.bf16.mxu1 %v3497_v1 }
 0x180   :  { %v1846_v52 = vpop.f32.mrf.mxu0 }
 0x181   :  { %v1887_v37 = vpop.f32.mrf.mxu1  ;;  %2569 = vmatpush2.bf16.msra.mxu0 %v3447_v48  ;;  %v1847_v26 = vadd.f32 %v1846_v52, %v3745_v49 }
 0x182   :  { %v1848_v56 = vpop.f32.mrf.mxu0  ;;  %2570 = vmatprep.subr.bf16.mxu0 %v3452_v50  ;;  %2610 = vmatpush2.bf16.msra.mxu1 %v3495_v3 }
 0x183   :  { %v1889_v57 = vpop.f32.mrf.mxu1  ;;  %v1849_v61 = vadd.f32 %v1848_v56, %v3748_v53  ;;  %v1888_v17 = vadd.f32 %v1887_v37, %v1847_v26  ;;  %v3498_v53 = vld [vmem:[#allocation8 + $0x180] ss:$8 sps:$4 sm:$0xff]   ;;  %2611 = vmatprep.subr.bf16.mxu1 %v3500_v9 }
 0x184   :  { %v1850_v58 = vpop.f32.mrf.mxu0 }
 0x185   :  { %v1891_v59 = vpop.f32.mrf.mxu1  ;;  %2571 = vmatpush2.bf16.msra.mxu0 %v3450_v54  ;;  %v1890_v2 = vadd.f32 %v1889_v57, %v1849_v61  ;;  %v2208_v58 = vld [vmem:[#allocation10] sm:$0x3] }
 0x186   :  { %v1851_v63 = vpop.f32.mrf.mxu0  ;;  %2612 = vmatpush2.bf16.msra.mxu1 %v3498_v53  ;;  %v2213_v59 = vrot.slane %v2208_v58, %v357_v32  ;;  %v2217_v60 = vrot.slane %v2208_v58, %v361_v35 }
 0x187   :  { %v1892_v0 = vpop.f32.mrf.mxu1 }
 0x188   :  { %v1928_v27 = vpop.f32.mrf.mxu0 }
 0x189   :  { %v1929_v4 = vadd.f32 %v1928_v27, %v1888_v17 }
 0x18a   :  { %v1930_v5 = vpop.f32.mrf.mxu0 }
 0x18b   :  { %v1931_v49 = vadd.f32 %v1930_v5, %v1890_v2  ;;  %v2140_v11 = vpack.c.bf16 %v1929_v4, %v1929_v4 }
 0x18c   :  { %v1932_v8 = vpop.f32.mrf.mxu0 }
 0x18d   :  { %v2141_v10 = vpack.c.bf16 %v1931_v49, %v1931_v49 }
 0x18e   :  { %v1933_v12 = vpop.f32.mrf.mxu0 }
 0x18f   :  { %2572 = vmatprep.mubr.bf16.mxu0 %v2141_v10 }
 0x190   :  { %2573 = vmatmul.mubr.bf16.vlgmr.msra.gmra.mxu0 %v2140_v11 }
 0x1c1   :  { %v1969_v13 = vpop.f32.mrf.mxu1 }
 0x1c2   :  { %v1970_v47 = vadd.f32 %v1969_v13, %v366_v28 }
 0x1c3   :  { %v1971_v14 = vpop.f32.mrf.mxu1 }
 0x1c4   :  { %v1972_v38 = vadd.f32 %v1971_v14, %v370_v30 }
 0x1c5   :  { %v1973_v15 = vpop.f32.mrf.mxu1 }
 0x1c7   :  { %v1974_v18 = vpop.f32.mrf.mxu1 }
 0x1c8   :  { %v2010_v19 = vpop.f32.mrf.mxu0 }
 0x1c9   :  { %v2011_v39 = vadd.f32 %v2010_v19, %v1970_v47 }
 0x1ca   :  { %v2012_v20 = vpop.f32.mrf.mxu0 }
 0x1cb   :  { %v2013_v41 = vadd.f32 %v2012_v20, %v1972_v38 }
 0x1cc   :  { %v2014_v21 = vpop.f32.mrf.mxu0 }
 0x1ce   :  { %v2015_v22 = vpop.f32.mrf.mxu0 }
 0x201   :  { %v2051_v29 = vpop.f32.mrf.mxu1 }
 0x202   :  { %v2052_v42 = vadd.f32 %v2051_v29, %v2011_v39 }
 0x203   :  { %v2053_v31 = vpop.f32.mrf.mxu1 }
 0x204   :  { %v2054_v44 = vadd.f32 %v2053_v31, %v2013_v41 }
 0x205   :  { %v2055_v34 = vpop.f32.mrf.mxu1 }
 0x207   :  { %v2056_v40 = vpop.f32.mrf.mxu1 }
 0x208   :  { %v2092_v6 = vpop.f32.mrf.mxu0 }
 0x209   :  { %v2133_v43 = vpop.f32.mrf.mxu1  ;;  %v2093_v45 = vadd.f32 %v2092_v6, %v2052_v42 }
 0x20a   :  { %v2094_v36 = vpop.f32.mrf.mxu0 }
 0x20b   :  { %v2135_v51 = vpop.f32.mrf.mxu1  ;;  %v2095_v46 = vadd.f32 %v2094_v36, %v2054_v44  ;;  %v2134_v7 = vadd.f32 %v2133_v43, %v2093_v45 }
 0x20c   :  { %v2096_v48 = vpop.f32.mrf.mxu0 }
 0x20d   :  { %v2137_v50 = vpop.f32.mrf.mxu1  ;;  %v2136_v52 = vadd.f32 %v2135_v51, %v2095_v46  ;;  %v2142_v54 = vpack.c.bf16 %v2134_v7, %v2134_v7 }
 0x20e   :  { %v2097_v33 = vpop.f32.mrf.mxu0 }
 0x20f   :  { %v2138_v37 = vpop.f32.mrf.mxu1  ;;  %v2143_v16 = vpack.c.bf16 %v2136_v52, %v2136_v52 }
 0x211   :  { %2613 = vmatprep.mubr.bf16.mxu1 %v2143_v16 }
 0x212   :  { %2614 = vmatmul.mubr.bf16.vlgmr.msra.gmra.mxu1 %v2142_v54 }
 0x250   :  { %v2574_v55 = vpop.f32.mrf.mxu0 }
 0x251   :  { %v2575_v62 = vadd.f32 %v2574_v55, %v2213_v59 }
 0x252   :  { %v2576_v56 = vpop.f32.mrf.mxu0 }
 0x253   :  { %v2577_v63 = vadd.f32 %v2576_v56, %v2217_v60 }
 0x254   :  { %v2578_v57 = vpop.f32.mrf.mxu0 }
 0x256   :  { %v2579_v26 = vpop.f32.mrf.mxu0 }
 0x2d2   :  { %v2615_v61 = vpop.f32.mrf.mxu1 }
 0x2d3   :  { %v2616_v17 = vadd.f32 %v2615_v61, %v2575_v62 }
 0x2d4   :  { %v2617_v0 = vpop.f32.mrf.mxu1 }
 0x2d5   :  { %v2618_v27 = vadd.f32 %v2617_v0, %v2577_v63 }
 0x2d6   :  { %v2619_v1 = vpop.f32.mrf.mxu1 }
 0x2d7   :  { %v2988_v2 = vpack.c.bf16 %v2618_v27, %v2616_v17 }
 0x2d8   :  { %v2620_v3 = vpop.f32.mrf.mxu1 }
 0x2d9   :  { %2630 = vst [vmem:[#allocation11] sm:$0xff] %v2988_v2 }
 0x2da   :  { %3612 = shalt.err (!%p3609_p1)
}
 0x2db   :  { %2640 = dma.vmem_to_hbm [thread:$0]  %s2638_s4, 128, %s3771_s5, [#allocation4]  }
 0x2dc   :  { %3627 = dma.done.wait [#allocation4], 128  }
 0x2dd   :  { %3628 = vsyncadd [#allocation4], 4294967168 }
 0x2de   :  { %2644 = vsyncpa [#allocation3], 1 }
 0x2df   :  { %2645 = vsyncpa [#allocation6], 1 }
 0x2e0   :  { %2646 = vsyncpa [#allocation9], 1 }
 0x2e1   :  { %2647 = vsyncpa [#allocation4], 1 }

</bundles_post_ra>
